<compile_context>
chip_gen: v5e
topology: v5e:2x2
jax: 0.10.0
libtpu: 0.0.40
codegen_flags: <defaults>
</compile_context>

<pallas_src>
import jax
import jax.numpy as jnp
from jax import lax
from jax.experimental import pallas as pl
from jax.experimental.pallas import tpu as pltpu


def _round_up(x, m):
    return (x + m - 1) // m * m


def _vmem_limit_bytes():
    # v5e/v6e: 128 MiB physical VMEM per TensorCore, v7x: 64 MiB.  Stay well
    # under the physical capacity of whatever generation we are running on.
    try:
        cap = int(pltpu.get_tpu_info().vmem_capacity_bytes)
    except Exception:
        cap = 64 * 1024 * 1024
    return int(min(cap * 3 // 5, 96 * 1024 * 1024))


# ---------------------------------------------------------------------------
# Fused kernel: expansion + head matmul + gate + grouped softmax + VLAD
#               aggregation + cluster-mean subtraction + intra-normalization.
# ---------------------------------------------------------------------------
def _nextvlad_fused(x, mask3, w_exp_t, b_exp, w_head, b_head, cw_nk, *,
                    groups, cluster_size, ts_max=128):
    B, S, F = x.shape
    EF = w_exp_t.shape[1]
    G, K = groups, cluster_size
    GK = G * K
    N = EF // G

    # Sequence tiling.  For S <= ts_max the block equals the full S dim (no
    # padding, always layout-legal).  For longer sequences, tile with ts_max
    # (multiple of 8) and pad with mask=0 rows; everything downstream flows
    # through act = softmax(...) * att and att is zero on padded rows, so the
    # padded rows contribute exactly nothing to the accumulators.
    if S <= ts_max:
        ts, Sp = S, S
    else:
        ts = ts_max
        Sp = _round_up(S, ts)
    if Sp != S:
        x = jnp.pad(x, ((0, 0), (0, Sp - S), (0, 0)))
        mask3 = jnp.pad(mask3, ((0, 0), (0, Sp - S), (0, 0)))

    def kernel(x_ref, m_ref, wexp_ref, bexp_ref, whead_ref, bhead_ref,
               cw_ref, out_ref, acc_ref, asum_ref):
        s_idx = pl.program_id(1)

        @pl.when(s_idx == 0)
        def _init():
            acc_ref[...] = jnp.zeros_like(acc_ref)
            asum_ref[...] = jnp.zeros_like(asum_ref)

        x_t = x_ref[0]                                     # (ts, F)
        msk = m_ref[0]                                     # (ts, 1)

        # Expansion linear (MXU, lane-dense).
        xe = jnp.dot(x_t, wexp_ref[...],
                     preferred_element_type=jnp.float32) + bexp_ref[...]
        # Single fused head matmul: columns [0, GK) = cluster logits,
        # columns [GK, GK+G) = attention logits (bias zero on cluster part).
        head = jnp.dot(xe, whead_ref[...],
                       preferred_element_type=jnp.float32) + bhead_ref[...]

        # Exact sigmoid (review: approx reciprocal bought nothing here) + mask.
        att = 1.0 / (1.0 + jnp.exp(-head[:, GK:GK + G]))   # (ts, G)
        att = att * msk

        # Grouped softmax + gate + rank-ts update of the VLAD accumulator.
        # Register-resident partial sums; one scratch RMW per grid step.
        acc_part = jnp.zeros((N, K), jnp.float32)
        asum_part = jnp.zeros((1, K), jnp.float32)
        for g in range(G):
            logits = head[:, g * K:(g + 1) * K]            # (ts, K)
            mx = jnp.max(logits, axis=-1, keepdims=True)
            e = jnp.exp(logits - mx)
            p = e / jnp.sum(e, axis=-1, keepdims=True)
            act_g = p * att[:, g:g + 1]                    # (ts, K)
            xe_g = xe[:, g * N:(g + 1) * N]                # (ts, N)
            asum_part = asum_part + jnp.sum(act_g, axis=0, keepdims=True)
            # (ts,N)^T @ (ts,K) -> (N,K); per-group operands are small so the
            # lhs relayout for the dim-0 contraction is negligible.
            acc_part = acc_part + lax.dot_general(
                xe_g, act_g, (((0,), (0,)), ((), ())),
                preferred_element_type=jnp.float32)
        acc_ref[...] += acc_part
        asum_ref[...] += asum_part

        @pl.when(s_idx == pl.num_programs(1) - 1)
        def _finalize():
            a = asum_ref[...] * cw_ref[...]                # (1,K)*(N,K)->(N,K)
            v = acc_ref[...] - a
            # F.normalize(v, p=2, dim=1): per-cluster-column L2 norm over N.
            norm = jnp.sqrt(jnp.sum(v * v, axis=0, keepdims=True))
            out_ref[0] = (v / jnp.maximum(norm, 1e-12)).astype(out_ref.dtype)

    return pl.pallas_call(
        kernel,
        out_shape=jax.ShapeDtypeStruct((B, N, K), jnp.float32),
        grid=(B, Sp // ts),
        in_specs=[
            pl.BlockSpec((1, ts, F), lambda b, s: (b, s, 0)),     # inputs
            pl.BlockSpec((1, ts, 1), lambda b, s: (b, s, 0)),     # mask
            pl.BlockSpec((F, EF), lambda b, s: (0, 0)),           # W_exp^T
            pl.BlockSpec((1, EF), lambda b, s: (0, 0)),           # b_exp
            pl.BlockSpec((EF, GK + G), lambda b, s: (0, 0)),      # [W_cl|W_att]^T
            pl.BlockSpec((1, GK + G), lambda b, s: (0, 0)),       # [0|b_att]
            pl.BlockSpec((N, K), lambda b, s: (0, 0)),            # cluster_weight
        ],
        out_specs=pl.BlockSpec((1, N, K), lambda b, s: (b, 0, 0)),
        scratch_shapes=[pltpu.VMEM((N, K), jnp.float32),
                        pltpu.VMEM((1, K), jnp.float32)],
        compiler_params=pltpu.CompilerParams(
            dimension_semantics=("parallel", "arbitrary"),
            vmem_limit_bytes=_vmem_limit_bytes()),
    )(x, mask3, w_exp_t, b_exp, w_head, b_head, cw_nk)


# ---------------------------------------------------------------------------
# Final fully-connected layer, tiled over batch rows.
# ---------------------------------------------------------------------------
def _fc_kernel(v_ref, w_ref, b_ref, o_ref):
    o_ref[...] = (jnp.dot(v_ref[...], w_ref[...],
                          preferred_element_type=jnp.float32)
                  + b_ref[...]).astype(o_ref.dtype)


def _fc(v, w_fc_t, b_fc):
    B, D = v.shape
    O = w_fc_t.shape[1]
    if B <= 256:
        tb, Bp = B, B
    else:
        tb = 256
        Bp = _round_up(B, tb)
    if Bp != B:
        v = jnp.pad(v, ((0, Bp - B), (0, 0)))
    out = pl.pallas_call(
        _fc_kernel,
        out_shape=jax.ShapeDtypeStruct((Bp, O), jnp.float32),
        grid=(Bp // tb,),
        in_specs=[
            pl.BlockSpec((tb, D), lambda i: (i, 0)),
            pl.BlockSpec((D, O), lambda i: (0, 0)),
            pl.BlockSpec((1, O), lambda i: (0, 0)),
        ],
        out_specs=pl.BlockSpec((tb, O), lambda i: (i, 0)),
        compiler_params=pltpu.CompilerParams(
            dimension_semantics=("parallel",),
            vmem_limit_bytes=_vmem_limit_bytes()),
    )(v, w_fc_t, b_fc)
    return out[:B]


# ---------------------------------------------------------------------------
# One-time parameter preparation (kept out of the per-call hot path).
# ---------------------------------------------------------------------------
def prepare_params(params, *, groups, cluster_size, expansion, feature_size):
    EF = expansion * feature_size
    G, K = groups, cluster_size
    GK = G * K
    N = EF // G
    w_head = jnp.concatenate([params["w_cl"].T, params["w_att"].T], axis=1)
    b_head = jnp.concatenate(
        [jnp.zeros((GK,), params["b_att"].dtype), params["b_att"]]
    ).reshape(1, GK + G)
    return {
        "w_exp_t": params["w_exp"].T,                      # (F, EF)
        "b_exp": params["b_exp"].reshape(1, EF),
        "w_head": w_head,                                  # (EF, GK+G)
        "b_head": b_head,                                  # (1, GK+G)
        "cw_nk": params["cluster_weight"].reshape(N, K),   # (N, K)
        "w_fc_t": params["w_fc"].T,                        # (N*K, O)
        "b_fc": params["b_fc"].reshape(1, -1),             # (1, O)
    }


# ---------------------------------------------------------------------------
# Full NeXtVLAD forward (eval mode).
# ---------------------------------------------------------------------------
def nextvlad_pallas(x, mask, prepped, *, groups, cluster_size, expansion):
    B, S, F = x.shape
    EF = expansion * F
    G, K = groups, cluster_size
    N = EF // G

    mask3 = mask.reshape(B, S, 1).astype(jnp.float32)
    vlad = _nextvlad_fused(
        x.astype(jnp.float32), mask3,
        prepped["w_exp_t"], prepped["b_exp"],
        prepped["w_head"], prepped["b_head"], prepped["cw_nk"],
        groups=G, cluster_size=K)                          # (B, N, K)

    # Contiguous (B,N,K) -> (B,N*K): pure metadata reshape, no data movement.
    vlad_flat = vlad.reshape(B, N * K)

    # TODO(synk): nn.Dropout(p=0.2) is identity in eval/inference mode;
    # train-mode stochastic masking is intentionally not implemented.
    return _fc(vlad_flat, prepped["w_fc_t"], prepped["b_fc"])


# ---------------------------------------------------------------------------
# Pure-JAX reference (mirrors the PyTorch forward, eval mode).
# ---------------------------------------------------------------------------
def nextvlad_ref(x, mask, params, *, groups, cluster_size, expansion):
    B, S, F = x.shape
    EF = expansion * F
    G, K = groups, cluster_size
    N = EF // G
    xe = x @ params["w_exp"].T + params["b_exp"]
    att = jax.nn.sigmoid(xe @ params["w_att"].T + params["b_att"])
    att = (att * mask[..., None]).reshape(B, S * G, 1)
    act = (xe.reshape(B * S, EF) @ params["w_cl"].T).reshape(B, S * G, K)
    act = jax.nn.softmax(act, axis=-1) * att
    a = act.sum(axis=-2, keepdims=True) * params["cluster_weight"]   # (B,N,K)
    vlad = jnp.matmul(jnp.transpose(act, (0, 2, 1)), xe.reshape(B, S * G, N))
    vlad = jnp.transpose(vlad, (0, 2, 1)) - a
    norm = jnp.sqrt(jnp.sum(vlad * vlad, axis=1, keepdims=True))
    vlad = (vlad / jnp.maximum(norm, 1e-12)).reshape(B, N * K)
    return vlad @ params["w_fc"].T + params["b_fc"]


if __name__ == "__main__":
    # Small shapes consistent with the module (F=64, E=2, G=8, K=16, O=128).
    B, S = 2, 8
    feature_size, cluster_size, groups = 64, 16, 8
    expansion, output_size = 2, 128
    EF = expansion * feature_size
    N = EF // groups

    key = jax.random.PRNGKey(0)
    ks = jax.random.split(key, 9)

    def rn(k, shape, scale):
        return jax.random.normal(k, shape, dtype=jnp.float32) * scale

    params = {
        # PyTorch nn.Linear convention: weight is (out, in).
        "w_exp": rn(ks[0], (EF, feature_size), 1.0 / jnp.sqrt(feature_size)),
        "b_exp": rn(ks[1], (EF,), 0.1),
        "w_att": rn(ks[2], (groups, EF), 1.0 / jnp.sqrt(EF)),
        "b_att": rn(ks[3], (groups,), 0.1),
        "w_cl": rn(ks[4], (groups * cluster_size, EF), 1.0 / jnp.sqrt(EF)),
        "cluster_weight": rn(ks[5], (1, N, cluster_size), 0.01),
        "w_fc": rn(ks[6], (output_size, N * cluster_size),
                   1.0 / jnp.sqrt(N * cluster_size)),
        "b_fc": rn(ks[7], (output_size,), 0.1),
    }
    x = jax.random.normal(ks[8], (B, S, feature_size), dtype=jnp.float32)
    mask = jnp.ones((B, S), dtype=jnp.float32).at[1, S - 2:].set(0.0)

    prepped = prepare_params(params, groups=groups, cluster_size=cluster_size,
                             expansion=expansion, feature_size=feature_size)

    out = nextvlad_pallas(x, mask, prepped, groups=groups,
                          cluster_size=cluster_size, expansion=expansion)
    out = jax.block_until_ready(out)

    ref = nextvlad_ref(x, mask, params, groups=groups,
                       cluster_size=cluster_size, expansion=expansion)
    assert out.shape == (B, output_size)
    # Exact sigmoid / f32 MXU everywhere -> tight tolerance.
    assert jnp.allclose(out, ref, atol=1e-4, rtol=1e-4), "mismatch vs reference"

    print("KERNEL_OK")
</pallas_src>

<mosaic_0001>
module attributes {stable_mosaic.version = 11 : i64} {
  func.func @kernel(%arg0: i32, %arg1: i32, %arg2: memref<1x8x64xf32, #tpu.memory_space<vmem>>, %arg3: memref<1x8x1xf32, #tpu.memory_space<vmem>>, %arg4: memref<64x128xf32, #tpu.memory_space<vmem>>, %arg5: memref<1x128xf32, #tpu.memory_space<vmem>>, %arg6: memref<128x136xf32, #tpu.memory_space<vmem>>, %arg7: memref<1x136xf32, #tpu.memory_space<vmem>>, %arg8: memref<16x16xf32, #tpu.memory_space<vmem>>, %arg9: memref<1x16x16xf32, #tpu.memory_space<vmem>>, %arg10: memref<16x16xf32, #tpu.memory_space<vmem>>, %arg11: memref<1x16xf32, #tpu.memory_space<vmem>>) attributes {dimension_semantics = [#tpu.dimension_semantics<parallel>, #tpu.dimension_semantics<arbitrary>], iteration_bounds = array<i64: 2, 1>, scalar_prefetch = 0 : i64, scratch_operands = 2 : i64, tpu.core_type = #tpu.core_type<tc>, window_params = [{transform_indices = @transform_0, window_bounds = array<i64: 1, 8, 64>}, {transform_indices = @transform_1, window_bounds = array<i64: 1, 8, 1>}, {pipeline_mode = #tpu.pipeline_mode<synchronous>, transform_indices = @transform_2, window_bounds = array<i64: 64, 128>}, {pipeline_mode = #tpu.pipeline_mode<synchronous>, transform_indices = @transform_3, window_bounds = array<i64: 1, 128>}, {pipeline_mode = #tpu.pipeline_mode<synchronous>, transform_indices = @transform_4, window_bounds = array<i64: 128, 136>}, {pipeline_mode = #tpu.pipeline_mode<synchronous>, transform_indices = @transform_5, window_bounds = array<i64: 1, 136>}, {pipeline_mode = #tpu.pipeline_mode<synchronous>, transform_indices = @transform_6, window_bounds = array<i64: 16, 16>}, {transform_indices = @transform_7, window_bounds = array<i64: 1, 16, 16>}]} {
    %c0_i32 = arith.constant 0 : i32
    %0 = arith.cmpi eq, %arg1, %c0_i32 : i32
    %1 = arith.extui %0 : i1 to i32
    %c0_i32_0 = arith.constant 0 : i32
    %2 = arith.cmpi ne, %1, %c0_i32_0 : i32
    scf.if %2 {
      %cst_62 = arith.constant 0.000000e+00 : f32
      %190 = vector.broadcast %cst_62 : f32 to vector<16x16xf32>
      %c0_63 = arith.constant 0 : index
      %c0_64 = arith.constant 0 : index
      %191 = vector.load %arg10[%c0_63, %c0_64] : memref<16x16xf32, #tpu.memory_space<vmem>>, vector<16x16xf32>
      tpu.vector_store %arg10[%c0_63, %c0_64], %190 {strides = array<i32>} : memref<16x16xf32, #tpu.memory_space<vmem>>, vector<16x16xf32>,
      %cst_65 = arith.constant 0.000000e+00 : f32
      %192 = vector.broadcast %cst_65 : f32 to vector<1x16xf32>
      %c0_66 = arith.constant 0 : index
      %c0_67 = arith.constant 0 : index
      %193 = vector.load %arg11[%c0_66, %c0_67] : memref<1x16xf32, #tpu.memory_space<vmem>>, vector<1x16xf32>
      tpu.vector_store %arg11[%c0_66, %c0_67], %192 {strides = array<i32>} : memref<1x16xf32, #tpu.memory_space<vmem>>, vector<1x16xf32>,
    } else {
    }
    %c0 = arith.constant 0 : index
    %c0_1 = arith.constant 0 : index
    %c0_2 = arith.constant 0 : index
    %3 = vector.load %arg2[%c0, %c0_1, %c0_2] : memref<1x8x64xf32, #tpu.memory_space<vmem>>, vector<1x8x64xf32>
    %4 = vector.shape_cast %3 : vector<1x8x64xf32> to vector<8x64xf32>
    %c0_3 = arith.constant 0 : index
    %c0_4 = arith.constant 0 : index
    %c0_5 = arith.constant 0 : index
    %5 = vector.load %arg3[%c0_3, %c0_4, %c0_5] : memref<1x8x1xf32, #tpu.memory_space<vmem>>, vector<1x8x1xf32>
    %6 = vector.shape_cast %5 : vector<1x8x1xf32> to vector<8x1xf32>
    %c0_6 = arith.constant 0 : index
    %c0_7 = arith.constant 0 : index
    %7 = vector.load %arg4[%c0_6, %c0_7] : memref<64x128xf32, #tpu.memory_space<vmem>>, vector<64x128xf32>
    %cst = arith.constant dense<0.000000e+00> : vector<8x128xf32>
    %8 = tpu.matmul %4, %7, %cst {dimension_numbers = #tpu.dot_dimension_numbers<[1], [0], [0], [1], [0, 0, 1, 1], [], []>} : vector<8x64xf32>, vector<64x128xf32>, vector<8x128xf32> -> vector<8x128xf32>
    %c0_8 = arith.constant 0 : index
    %c0_9 = arith.constant 0 : index
    %9 = vector.load %arg5[%c0_8, %c0_9] : memref<1x128xf32, #tpu.memory_space<vmem>>, vector<1x128xf32>
    %10 = vector.broadcast %9 : vector<1x128xf32> to vector<8x128xf32>
    %11 = arith.addf %8, %10 : vector<8x128xf32>
    %c0_10 = arith.constant 0 : index
    %c0_11 = arith.constant 0 : index
    %12 = vector.load %arg6[%c0_10, %c0_11] : memref<128x136xf32, #tpu.memory_space<vmem>>, vector<128x136xf32>
    %cst_12 = arith.constant dense<0.000000e+00> : vector<8x136xf32>
    %13 = tpu.matmul %11, %12, %cst_12 {dimension_numbers = #tpu.dot_dimension_numbers<[1], [0], [0], [1], [0, 0, 1, 1], [], []>} : vector<8x128xf32>, vector<128x136xf32>, vector<8x136xf32> -> vector<8x136xf32>
    %c0_13 = arith.constant 0 : index
    %c0_14 = arith.constant 0 : index
    %14 = vector.load %arg7[%c0_13, %c0_14] : memref<1x136xf32, #tpu.memory_space<vmem>>, vector<1x136xf32>
    %15 = vector.broadcast %14 : vector<1x136xf32> to vector<8x136xf32>
    %16 = arith.addf %13, %15 : vector<8x136xf32>
    %17 = vector.extract_strided_slice %16 {offsets = [0, 128], sizes = [8, 8], strides = [1, 1]} : vector<8x136xf32> to vector<8x8xf32>
    %cst_15 = arith.constant 0.000000e+00 : f32
    %18 = vector.broadcast %cst_15 : f32 to vector<8x8xf32>
    %19 = arith.subf %18, %17 : vector<8x8xf32>
    %20 = math.exp %19 : vector<8x8xf32>
    %cst_16 = arith.constant 1.000000e+00 : f32
    %21 = vector.broadcast %cst_16 : f32 to vector<8x8xf32>
    %22 = arith.addf %21, %20 : vector<8x8xf32>
    %cst_17 = arith.constant 1.000000e+00 : f32
    %23 = vector.broadcast %cst_17 : f32 to vector<8x8xf32>
    %24 = arith.divf %23, %22 : vector<8x8xf32>
    %25 = vector.broadcast %6 : vector<8x1xf32> to vector<8x8xf32>
    %26 = arith.mulf %24, %25 : vector<8x8xf32>
    %cst_18 = arith.constant 0.000000e+00 : f32
    %27 = vector.broadcast %cst_18 : f32 to vector<16x16xf32>
    %cst_19 = arith.constant 0.000000e+00 : f32
    %28 = vector.broadcast %cst_19 : f32 to vector<1x16xf32>
    %29 = vector.extract_strided_slice %16 {offsets = [0, 0], sizes = [8, 16], strides = [1, 1]} : vector<8x136xf32> to vector<8x16xf32>
    %cst_20 = arith.constant dense<0xFF800000> : vector<8xf32>
    %30 = vector.multi_reduction <maximumf>, %29, %cst_20 [1] : vector<8x16xf32> to vector<8xf32>
    %31 = vector.shape_cast %30 : vector<8xf32> to vector<8x1xf32>
    %32 = vector.broadcast %31 : vector<8x1xf32> to vector<8x16xf32>
    %33 = arith.subf %29, %32 : vector<8x16xf32>
    %34 = math.exp %33 : vector<8x16xf32>
    %cst_21 = arith.constant dense<0.000000e+00> : vector<8xf32>
    %35 = vector.multi_reduction <add>, %34, %cst_21 [1] : vector<8x16xf32> to vector<8xf32>
    %36 = vector.shape_cast %35 : vector<8xf32> to vector<8x1xf32>
    %37 = vector.broadcast %36 : vector<8x1xf32> to vector<8x16xf32>
    %38 = arith.divf %34, %37 : vector<8x16xf32>
    %39 = vector.extract_strided_slice %26 {offsets = [0, 0], sizes = [8, 1], strides = [1, 1]} : vector<8x8xf32> to vector<8x1xf32>
    %40 = vector.broadcast %39 : vector<8x1xf32> to vector<8x16xf32>
    %41 = arith.mulf %38, %40 : vector<8x16xf32>
    %42 = vector.extract_strided_slice %11 {offsets = [0, 0], sizes = [8, 16], strides = [1, 1]} : vector<8x128xf32> to vector<8x16xf32>
    %cst_22 = arith.constant dense<0.000000e+00> : vector<16xf32>
    %43 = vector.multi_reduction <add>, %41, %cst_22 [0] : vector<8x16xf32> to vector<16xf32>
    %44 = vector.shape_cast %43 : vector<16xf32> to vector<1x16xf32>
    %45 = arith.addf %28, %44 : vector<1x16xf32>
    %cst_23 = arith.constant dense<0.000000e+00> : vector<16x16xf32>
    %46 = tpu.matmul %42, %41, %cst_23 {dimension_numbers = #tpu.dot_dimension_numbers<[0], [0], [1], [1], [0, 1, 1, 1], [], []>} : vector<8x16xf32>, vector<8x16xf32>, vector<16x16xf32> -> vector<16x16xf32>
    %47 = arith.addf %27, %46 : vector<16x16xf32>
    %48 = vector.extract_strided_slice %16 {offsets = [0, 16], sizes = [8, 16], strides = [1, 1]} : vector<8x136xf32> to vector<8x16xf32>
    %cst_24 = arith.constant dense<0xFF800000> : vector<8xf32>
    %49 = vector.multi_reduction <maximumf>, %48, %cst_24 [1] : vector<8x16xf32> to vector<8xf32>
    %50 = vector.shape_cast %49 : vector<8xf32> to vector<8x1xf32>
    %51 = vector.broadcast %50 : vector<8x1xf32> to vector<8x16xf32>
    %52 = arith.subf %48, %51 : vector<8x16xf32>
    %53 = math.exp %52 : vector<8x16xf32>
    %cst_25 = arith.constant dense<0.000000e+00> : vector<8xf32>
    %54 = vector.multi_reduction <add>, %53, %cst_25 [1] : vector<8x16xf32> to vector<8xf32>
    %55 = vector.shape_cast %54 : vector<8xf32> to vector<8x1xf32>
    %56 = vector.broadcast %55 : vector<8x1xf32> to vector<8x16xf32>
    %57 = arith.divf %53, %56 : vector<8x16xf32>
    %58 = vector.extract_strided_slice %26 {offsets = [0, 1], sizes = [8, 1], strides = [1, 1]} : vector<8x8xf32> to vector<8x1xf32>
    %59 = vector.broadcast %58 : vector<8x1xf32> to vector<8x16xf32>
    %60 = arith.mulf %57, %59 : vector<8x16xf32>
    %61 = vector.extract_strided_slice %11 {offsets = [0, 16], sizes = [8, 16], strides = [1, 1]} : vector<8x128xf32> to vector<8x16xf32>
    %cst_26 = arith.constant dense<0.000000e+00> : vector<16xf32>
    %62 = vector.multi_reduction <add>, %60, %cst_26 [0] : vector<8x16xf32> to vector<16xf32>
    %63 = vector.shape_cast %62 : vector<16xf32> to vector<1x16xf32>
    %64 = arith.addf %45, %63 : vector<1x16xf32>
    %cst_27 = arith.constant dense<0.000000e+00> : vector<16x16xf32>
    %65 = tpu.matmul %61, %60, %cst_27 {dimension_numbers = #tpu.dot_dimension_numbers<[0], [0], [1], [1], [0, 1, 1, 1], [], []>} : vector<8x16xf32>, vector<8x16xf32>, vector<16x16xf32> -> vector<16x16xf32>
    %66 = arith.addf %47, %65 : vector<16x16xf32>
    %67 = vector.extract_strided_slice %16 {offsets = [0, 32], sizes = [8, 16], strides = [1, 1]} : vector<8x136xf32> to vector<8x16xf32>
    %cst_28 = arith.constant dense<0xFF800000> : vector<8xf32>
    %68 = vector.multi_reduction <maximumf>, %67, %cst_28 [1] : vector<8x16xf32> to vector<8xf32>
    %69 = vector.shape_cast %68 : vector<8xf32> to vector<8x1xf32>
    %70 = vector.broadcast %69 : vector<8x1xf32> to vector<8x16xf32>
    %71 = arith.subf %67, %70 : vector<8x16xf32>
    %72 = math.exp %71 : vector<8x16xf32>
    %cst_29 = arith.constant dense<0.000000e+00> : vector<8xf32>
    %73 = vector.multi_reduction <add>, %72, %cst_29 [1] : vector<8x16xf32> to vector<8xf32>
    %74 = vector.shape_cast %73 : vector<8xf32> to vector<8x1xf32>
    %75 = vector.broadcast %74 : vector<8x1xf32> to vector<8x16xf32>
    %76 = arith.divf %72, %75 : vector<8x16xf32>
    %77 = vector.extract_strided_slice %26 {offsets = [0, 2], sizes = [8, 1], strides = [1, 1]} : vector<8x8xf32> to vector<8x1xf32>
    %78 = vector.broadcast %77 : vector<8x1xf32> to vector<8x16xf32>
    %79 = arith.mulf %76, %78 : vector<8x16xf32>
    %80 = vector.extract_strided_slice %11 {offsets = [0, 32], sizes = [8, 16], strides = [1, 1]} : vector<8x128xf32> to vector<8x16xf32>
    %cst_30 = arith.constant dense<0.000000e+00> : vector<16xf32>
    %81 = vector.multi_reduction <add>, %79, %cst_30 [0] : vector<8x16xf32> to vector<16xf32>
    %82 = vector.shape_cast %81 : vector<16xf32> to vector<1x16xf32>
    %83 = arith.addf %64, %82 : vector<1x16xf32>
    %cst_31 = arith.constant dense<0.000000e+00> : vector<16x16xf32>
    %84 = tpu.matmul %80, %79, %cst_31 {dimension_numbers = #tpu.dot_dimension_numbers<[0], [0], [1], [1], [0, 1, 1, 1], [], []>} : vector<8x16xf32>, vector<8x16xf32>, vector<16x16xf32> -> vector<16x16xf32>
    %85 = arith.addf %66, %84 : vector<16x16xf32>
    %86 = vector.extract_strided_slice %16 {offsets = [0, 48], sizes = [8, 16], strides = [1, 1]} : vector<8x136xf32> to vector<8x16xf32>
    %cst_32 = arith.constant dense<0xFF800000> : vector<8xf32>
    %87 = vector.multi_reduction <maximumf>, %86, %cst_32 [1] : vector<8x16xf32> to vector<8xf32>
    %88 = vector.shape_cast %87 : vector<8xf32> to vector<8x1xf32>
    %89 = vector.broadcast %88 : vector<8x1xf32> to vector<8x16xf32>
    %90 = arith.subf %86, %89 : vector<8x16xf32>
    %91 = math.exp %90 : vector<8x16xf32>
    %cst_33 = arith.constant dense<0.000000e+00> : vector<8xf32>
    %92 = vector.multi_reduction <add>, %91, %cst_33 [1] : vector<8x16xf32> to vector<8xf32>
    %93 = vector.shape_cast %92 : vector<8xf32> to vector<8x1xf32>
    %94 = vector.broadcast %93 : vector<8x1xf32> to vector<8x16xf32>
    %95 = arith.divf %91, %94 : vector<8x16xf32>
    %96 = vector.extract_strided_slice %26 {offsets = [0, 3], sizes = [8, 1], strides = [1, 1]} : vector<8x8xf32> to vector<8x1xf32>
    %97 = vector.broadcast %96 : vector<8x1xf32> to vector<8x16xf32>
    %98 = arith.mulf %95, %97 : vector<8x16xf32>
    %99 = vector.extract_strided_slice %11 {offsets = [0, 48], sizes = [8, 16], strides = [1, 1]} : vector<8x128xf32> to vector<8x16xf32>
    %cst_34 = arith.constant dense<0.000000e+00> : vector<16xf32>
    %100 = vector.multi_reduction <add>, %98, %cst_34 [0] : vector<8x16xf32> to vector<16xf32>
    %101 = vector.shape_cast %100 : vector<16xf32> to vector<1x16xf32>
    %102 = arith.addf %83, %101 : vector<1x16xf32>
    %cst_35 = arith.constant dense<0.000000e+00> : vector<16x16xf32>
    %103 = tpu.matmul %99, %98, %cst_35 {dimension_numbers = #tpu.dot_dimension_numbers<[0], [0], [1], [1], [0, 1, 1, 1], [], []>} : vector<8x16xf32>, vector<8x16xf32>, vector<16x16xf32> -> vector<16x16xf32>
    %104 = arith.addf %85, %103 : vector<16x16xf32>
    %105 = vector.extract_strided_slice %16 {offsets = [0, 64], sizes = [8, 16], strides = [1, 1]} : vector<8x136xf32> to vector<8x16xf32>
    %cst_36 = arith.constant dense<0xFF800000> : vector<8xf32>
    %106 = vector.multi_reduction <maximumf>, %105, %cst_36 [1] : vector<8x16xf32> to vector<8xf32>
    %107 = vector.shape_cast %106 : vector<8xf32> to vector<8x1xf32>
    %108 = vector.broadcast %107 : vector<8x1xf32> to vector<8x16xf32>
    %109 = arith.subf %105, %108 : vector<8x16xf32>
    %110 = math.exp %109 : vector<8x16xf32>
    %cst_37 = arith.constant dense<0.000000e+00> : vector<8xf32>
    %111 = vector.multi_reduction <add>, %110, %cst_37 [1] : vector<8x16xf32> to vector<8xf32>
    %112 = vector.shape_cast %111 : vector<8xf32> to vector<8x1xf32>
    %113 = vector.broadcast %112 : vector<8x1xf32> to vector<8x16xf32>
    %114 = arith.divf %110, %113 : vector<8x16xf32>
    %115 = vector.extract_strided_slice %26 {offsets = [0, 4], sizes = [8, 1], strides = [1, 1]} : vector<8x8xf32> to vector<8x1xf32>
    %116 = vector.broadcast %115 : vector<8x1xf32> to vector<8x16xf32>
    %117 = arith.mulf %114, %116 : vector<8x16xf32>
    %118 = vector.extract_strided_slice %11 {offsets = [0, 64], sizes = [8, 16], strides = [1, 1]} : vector<8x128xf32> to vector<8x16xf32>
    %cst_38 = arith.constant dense<0.000000e+00> : vector<16xf32>
    %119 = vector.multi_reduction <add>, %117, %cst_38 [0] : vector<8x16xf32> to vector<16xf32>
    %120 = vector.shape_cast %119 : vector<16xf32> to vector<1x16xf32>
    %121 = arith.addf %102, %120 : vector<1x16xf32>
    %cst_39 = arith.constant dense<0.000000e+00> : vector<16x16xf32>
    %122 = tpu.matmul %118, %117, %cst_39 {dimension_numbers = #tpu.dot_dimension_numbers<[0], [0], [1], [1], [0, 1, 1, 1], [], []>} : vector<8x16xf32>, vector<8x16xf32>, vector<16x16xf32> -> vector<16x16xf32>
    %123 = arith.addf %104, %122 : vector<16x16xf32>
    %124 = vector.extract_strided_slice %16 {offsets = [0, 80], sizes = [8, 16], strides = [1, 1]} : vector<8x136xf32> to vector<8x16xf32>
    %cst_40 = arith.constant dense<0xFF800000> : vector<8xf32>
    %125 = vector.multi_reduction <maximumf>, %124, %cst_40 [1] : vector<8x16xf32> to vector<8xf32>
    %126 = vector.shape_cast %125 : vector<8xf32> to vector<8x1xf32>
    %127 = vector.broadcast %126 : vector<8x1xf32> to vector<8x16xf32>
    %128 = arith.subf %124, %127 : vector<8x16xf32>
    %129 = math.exp %128 : vector<8x16xf32>
    %cst_41 = arith.constant dense<0.000000e+00> : vector<8xf32>
    %130 = vector.multi_reduction <add>, %129, %cst_41 [1] : vector<8x16xf32> to vector<8xf32>
    %131 = vector.shape_cast %130 : vector<8xf32> to vector<8x1xf32>
    %132 = vector.broadcast %131 : vector<8x1xf32> to vector<8x16xf32>
    %133 = arith.divf %129, %132 : vector<8x16xf32>
    %134 = vector.extract_strided_slice %26 {offsets = [0, 5], sizes = [8, 1], strides = [1, 1]} : vector<8x8xf32> to vector<8x1xf32>
    %135 = vector.broadcast %134 : vector<8x1xf32> to vector<8x16xf32>
    %136 = arith.mulf %133, %135 : vector<8x16xf32>
    %137 = vector.extract_strided_slice %11 {offsets = [0, 80], sizes = [8, 16], strides = [1, 1]} : vector<8x128xf32> to vector<8x16xf32>
    %cst_42 = arith.constant dense<0.000000e+00> : vector<16xf32>
    %138 = vector.multi_reduction <add>, %136, %cst_42 [0] : vector<8x16xf32> to vector<16xf32>
    %139 = vector.shape_cast %138 : vector<16xf32> to vector<1x16xf32>
    %140 = arith.addf %121, %139 : vector<1x16xf32>
    %cst_43 = arith.constant dense<0.000000e+00> : vector<16x16xf32>
    %141 = tpu.matmul %137, %136, %cst_43 {dimension_numbers = #tpu.dot_dimension_numbers<[0], [0], [1], [1], [0, 1, 1, 1], [], []>} : vector<8x16xf32>, vector<8x16xf32>, vector<16x16xf32> -> vector<16x16xf32>
    %142 = arith.addf %123, %141 : vector<16x16xf32>
    %143 = vector.extract_strided_slice %16 {offsets = [0, 96], sizes = [8, 16], strides = [1, 1]} : vector<8x136xf32> to vector<8x16xf32>
    %cst_44 = arith.constant dense<0xFF800000> : vector<8xf32>
    %144 = vector.multi_reduction <maximumf>, %143, %cst_44 [1] : vector<8x16xf32> to vector<8xf32>
    %145 = vector.shape_cast %144 : vector<8xf32> to vector<8x1xf32>
    %146 = vector.broadcast %145 : vector<8x1xf32> to vector<8x16xf32>
    %147 = arith.subf %143, %146 : vector<8x16xf32>
    %148 = math.exp %147 : vector<8x16xf32>
    %cst_45 = arith.constant dense<0.000000e+00> : vector<8xf32>
    %149 = vector.multi_reduction <add>, %148, %cst_45 [1] : vector<8x16xf32> to vector<8xf32>
    %150 = vector.shape_cast %149 : vector<8xf32> to vector<8x1xf32>
    %151 = vector.broadcast %150 : vector<8x1xf32> to vector<8x16xf32>
    %152 = arith.divf %148, %151 : vector<8x16xf32>
    %153 = vector.extract_strided_slice %26 {offsets = [0, 6], sizes = [8, 1], strides = [1, 1]} : vector<8x8xf32> to vector<8x1xf32>
    %154 = vector.broadcast %153 : vector<8x1xf32> to vector<8x16xf32>
    %155 = arith.mulf %152, %154 : vector<8x16xf32>
    %156 = vector.extract_strided_slice %11 {offsets = [0, 96], sizes = [8, 16], strides = [1, 1]} : vector<8x128xf32> to vector<8x16xf32>
    %cst_46 = arith.constant dense<0.000000e+00> : vector<16xf32>
    %157 = vector.multi_reduction <add>, %155, %cst_46 [0] : vector<8x16xf32> to vector<16xf32>
    %158 = vector.shape_cast %157 : vector<16xf32> to vector<1x16xf32>
    %159 = arith.addf %140, %158 : vector<1x16xf32>
    %cst_47 = arith.constant dense<0.000000e+00> : vector<16x16xf32>
    %160 = tpu.matmul %156, %155, %cst_47 {dimension_numbers = #tpu.dot_dimension_numbers<[0], [0], [1], [1], [0, 1, 1, 1], [], []>} : vector<8x16xf32>, vector<8x16xf32>, vector<16x16xf32> -> vector<16x16xf32>
    %161 = arith.addf %142, %160 : vector<16x16xf32>
    %162 = vector.extract_strided_slice %16 {offsets = [0, 112], sizes = [8, 16], strides = [1, 1]} : vector<8x136xf32> to vector<8x16xf32>
    %cst_48 = arith.constant dense<0xFF800000> : vector<8xf32>
    %163 = vector.multi_reduction <maximumf>, %162, %cst_48 [1] : vector<8x16xf32> to vector<8xf32>
    %164 = vector.shape_cast %163 : vector<8xf32> to vector<8x1xf32>
    %165 = vector.broadcast %164 : vector<8x1xf32> to vector<8x16xf32>
    %166 = arith.subf %162, %165 : vector<8x16xf32>
    %167 = math.exp %166 : vector<8x16xf32>
    %cst_49 = arith.constant dense<0.000000e+00> : vector<8xf32>
    %168 = vector.multi_reduction <add>, %167, %cst_49 [1] : vector<8x16xf32> to vector<8xf32>
    %169 = vector.shape_cast %168 : vector<8xf32> to vector<8x1xf32>
    %170 = vector.broadcast %169 : vector<8x1xf32> to vector<8x16xf32>
    %171 = arith.divf %167, %170 : vector<8x16xf32>
    %172 = vector.extract_strided_slice %26 {offsets = [0, 7], sizes = [8, 1], strides = [1, 1]} : vector<8x8xf32> to vector<8x1xf32>
    %173 = vector.broadcast %172 : vector<8x1xf32> to vector<8x16xf32>
    %174 = arith.mulf %171, %173 : vector<8x16xf32>
    %175 = vector.extract_strided_slice %11 {offsets = [0, 112], sizes = [8, 16], strides = [1, 1]} : vector<8x128xf32> to vector<8x16xf32>
    %cst_50 = arith.constant dense<0.000000e+00> : vector<16xf32>
    %176 = vector.multi_reduction <add>, %174, %cst_50 [0] : vector<8x16xf32> to vector<16xf32>
    %177 = vector.shape_cast %176 : vector<16xf32> to vector<1x16xf32>
    %178 = arith.addf %159, %177 : vector<1x16xf32>
    %cst_51 = arith.constant dense<0.000000e+00> : vector<16x16xf32>
    %179 = tpu.matmul %175, %174, %cst_51 {dimension_numbers = #tpu.dot_dimension_numbers<[0], [0], [1], [1], [0, 1, 1, 1], [], []>} : vector<8x16xf32>, vector<8x16xf32>, vector<16x16xf32> -> vector<16x16xf32>
    %180 = arith.addf %161, %179 : vector<16x16xf32>
    %c0_52 = arith.constant 0 : index
    %c0_53 = arith.constant 0 : index
    %181 = vector.load %arg10[%c0_52, %c0_53] : memref<16x16xf32, #tpu.memory_space<vmem>>, vector<16x16xf32>
    %182 = arith.addf %181, %180 : vector<16x16xf32>
    %c0_54 = arith.constant 0 : index
    %c0_55 = arith.constant 0 : index
    %183 = vector.load %arg10[%c0_54, %c0_55] : memref<16x16xf32, #tpu.memory_space<vmem>>, vector<16x16xf32>
    tpu.vector_store %arg10[%c0_54, %c0_55], %182 {strides = array<i32>} : memref<16x16xf32, #tpu.memory_space<vmem>>, vector<16x16xf32>,
    %c0_56 = arith.constant 0 : index
    %c0_57 = arith.constant 0 : index
    %184 = vector.load %arg11[%c0_56, %c0_57] : memref<1x16xf32, #tpu.memory_space<vmem>>, vector<1x16xf32>
    %185 = arith.addf %184, %178 : vector<1x16xf32>
    %c0_58 = arith.constant 0 : index
    %c0_59 = arith.constant 0 : index
    %186 = vector.load %arg11[%c0_58, %c0_59] : memref<1x16xf32, #tpu.memory_space<vmem>>, vector<1x16xf32>
    tpu.vector_store %arg11[%c0_58, %c0_59], %185 {strides = array<i32>} : memref<1x16xf32, #tpu.memory_space<vmem>>, vector<1x16xf32>,
    %c0_i32_60 = arith.constant 0 : i32
    %187 = arith.cmpi eq, %arg1, %c0_i32_60 : i32
    %188 = arith.extui %187 : i1 to i32
    %c0_i32_61 = arith.constant 0 : i32
    %189 = arith.cmpi ne, %188, %c0_i32_61 : i32
    scf.if %189 {
      %c0_62 = arith.constant 0 : index
      %c0_63 = arith.constant 0 : index
      %190 = vector.load %arg11[%c0_62, %c0_63] : memref<1x16xf32, #tpu.memory_space<vmem>>, vector<1x16xf32>
      %c0_64 = arith.constant 0 : index
      %c0_65 = arith.constant 0 : index
      %191 = vector.load %arg8[%c0_64, %c0_65] : memref<16x16xf32, #tpu.memory_space<vmem>>, vector<16x16xf32>
      %192 = vector.broadcast %190 : vector<1x16xf32> to vector<16x16xf32>
      %193 = arith.mulf %192, %191 : vector<16x16xf32>
      %c0_66 = arith.constant 0 : index
      %c0_67 = arith.constant 0 : index
      %194 = vector.load %arg10[%c0_66, %c0_67] : memref<16x16xf32, #tpu.memory_space<vmem>>, vector<16x16xf32>
      %195 = arith.subf %194, %193 : vector<16x16xf32>
      %196 = arith.mulf %195, %195 : vector<16x16xf32>
      %cst_68 = arith.constant dense<0.000000e+00> : vector<16xf32>
      %197 = vector.multi_reduction <add>, %196, %cst_68 [0] : vector<16x16xf32> to vector<16xf32>
      %198 = vector.shape_cast %197 : vector<16xf32> to vector<1x16xf32>
      %199 = math.sqrt %198 : vector<1x16xf32>
      %cst_69 = arith.constant 9.99999996E-13 : f32
      %200 = vector.broadcast %cst_69 : f32 to vector<1x16xf32>
      %201 = arith.maximumf %199, %200 : vector<1x16xf32>
      %202 = vector.broadcast %201 : vector<1x16xf32> to vector<16x16xf32>
      %203 = arith.divf %195, %202 : vector<16x16xf32>
      %c0_70 = arith.constant 0 : index
      %c0_71 = arith.constant 0 : index
      %c0_72 = arith.constant 0 : index
      %204 = vector.load %arg9[%c0_70, %c0_71, %c0_72] : memref<1x16x16xf32, #tpu.memory_space<vmem>>, vector<1x16x16xf32>
      %205 = vector.shape_cast %204 : vector<1x16x16xf32> to vector<16x16xf32>
      %206 = vector.shape_cast %203 : vector<16x16xf32> to vector<1x16x16xf32>
      tpu.vector_store %arg9[%c0_70, %c0_71, %c0_72], %206 {strides = array<i32>} : memref<1x16x16xf32, #tpu.memory_space<vmem>>, vector<1x16x16xf32>,
    } else {
    }
    return
  }
  func.func @transform_0(%arg0: i32, %arg1: i32) -> (i32, i32, i32) {
    %c0_i32 = arith.constant 0 : i32
    %c0_i32_0 = arith.constant 0 : i32
    return %arg0, %arg1, %c0_i32 : i32, i32, i32
  }
  func.func @transform_1(%arg0: i32, %arg1: i32) -> (i32, i32, i32) {
    %c0_i32 = arith.constant 0 : i32
    %c0_i32_0 = arith.constant 0 : i32
    return %arg0, %arg1, %c0_i32 : i32, i32, i32
  }
  func.func @transform_2(%arg0: i32, %arg1: i32) -> (i32, i32) {
    %c0_i32 = arith.constant 0 : i32
    %c0_i32_0 = arith.constant 0 : i32
    %c0_i32_1 = arith.constant 0 : i32
    return %c0_i32, %c0_i32_0 : i32, i32
  }
  func.func @transform_3(%arg0: i32, %arg1: i32) -> (i32, i32) {
    %c0_i32 = arith.constant 0 : i32
    %c0_i32_0 = arith.constant 0 : i32
    %c0_i32_1 = arith.constant 0 : i32
    return %c0_i32, %c0_i32_0 : i32, i32
  }
  func.func @transform_4(%arg0: i32, %arg1: i32) -> (i32, i32) {
    %c0_i32 = arith.constant 0 : i32
    %c0_i32_0 = arith.constant 0 : i32
    %c0_i32_1 = arith.constant 0 : i32
    return %c0_i32, %c0_i32_0 : i32, i32
  }
  func.func @transform_5(%arg0: i32, %arg1: i32) -> (i32, i32) {
    %c0_i32 = arith.constant 0 : i32
    %c0_i32_0 = arith.constant 0 : i32
    %c0_i32_1 = arith.constant 0 : i32
    return %c0_i32, %c0_i32_0 : i32, i32
  }
  func.func @transform_6(%arg0: i32, %arg1: i32) -> (i32, i32) {
    %c0_i32 = arith.constant 0 : i32
    %c0_i32_0 = arith.constant 0 : i32
    %c0_i32_1 = arith.constant 0 : i32
    return %c0_i32, %c0_i32_0 : i32, i32
  }
  func.func @transform_7(%arg0: i32, %arg1: i32) -> (i32, i32, i32) {
    %c0_i32 = arith.constant 0 : i32
    %c0_i32_0 = arith.constant 0 : i32
    %c0_i32_1 = arith.constant 0 : i32
    return %arg0, %c0_i32, %c0_i32_0 : i32, i32, i32
  }
}

</mosaic_0001>

<bundles_post_ra>
// kernel: tpu_custom_call.1
= control target key start
LH: loop header
LB: loop body
LE: loop exit
PB: predicated region body
PF: predicated region fallthrough
CT: control target
= control target key end

     0   :  { %12 = vsyncpa [#allocation5], 0  ;;  %s2331_s0 = inlined_call_operand.vmem [shape: f32[2,8,64], index: 0, kind: input, shape index: {}]   ;;  %s2332_s1 = inlined_call_operand.vmem [shape: f32[2,8,1], index: 1, kind: input, shape index: {}]   ;;  %s2333_s2 = inlined_call_operand.vmem [shape: f32[64,128], index: 2, kind: input, shape index: {}]   ;;  %s2334_s3 = inlined_call_operand.vmem [shape: f32[1,128], index: 3, kind: input, shape index: {}]   ;;  %s2335_s4 = inlined_call_operand.vmem [shape: f32[128,136], index: 4, kind: input, shape index: {}]   ;;  %s2336_s5 = inlined_call_operand.vmem [shape: f32[1,136], index: 5, kind: input, shape index: {}]   ;;  %s2337_s6 = inlined_call_operand.vmem [shape: f32[16,16], index: 6, kind: input, shape index: {}]   ;;  %s2338_s7 = inlined_call_operand.hbm [shape: f32[2,16,16], index: 7, kind: output, shape index: {}]  }
   0x1   :  { %14 = vsyncpa [#allocation5 + $0x1], 0  ;;  %s1852_s24 = smov 0   ;;  %s1854_s25 = smov 0  }
   0x2   :  { %s1856_s26 = smov 0   ;;  %s1858_s27 = smov 0  }
   0x3   :  { %s1860_s28 = smov 0   ;;  %s1862_s29 = smov 0  }
   0x4 LB: > { %s1558_s30 = sadd.s32 4294967295, %s1792_s29   ;;  %s1559_s8 = sadd.s32 4294967294, %s1792_s29   ;;  %s1792_s29 = sphi %s1862_s29, %s20_s29   ;;  %s1788_s28 = sphi %s1860_s28, %s2347_s28   ;;  %s1784_s27 = sphi %s1858_s27, %s2346_s27   ;;  %s1780_s26 = sphi %s1856_s26, %s2345_s26   ;;  %s1776_s25 = sphi %s1854_s25, %s2344_s25   ;;  %s1772_s24 = sphi %s1852_s24, %s2343_s24  }
   0x5   : > { %s32_s9 = sadd.s32 1, %s1788_s28  ;;  %s200_s10 = sadd.s32 1, %s1780_s26 }
   0x6   : > { %p34_p0 = scmp.ge.s32.totalorder %s32_s9, 2  ;;  %p210_p1 = scmp.ne.s32.totalorder %s1780_s26, %s1776_s25 }
   0x7   : > { %p211_p2 = scmp.eq.s32.totalorder %s1558_s30, 1  ;;  %p216_p3 = scmp.ne.s32.totalorder %s1776_s25, %s1772_s24 }
   0x8   : > { %s2349_s9 = smov (%p34_p0, %s32_s9), 0  ;;  %p217_p5 = scmp.eq.s32.totalorder %s1559_s8, 1 }
   0x9   : > { %p1892_p4 = por %p211_p2, %p210_p1  ;;  %s197_s12 = ssub.s32 %s1788_s28, %s2349_s9 }
   0xa   : > { %p1562_p6 = scmp.ge.s32.totalorder %s1792_s29, 1  ;;  %p198_p7 = scmp.eq.s32.totalorder %s197_s12, 0 }
   0xb   : > { %p1899_p8 = por %p217_p5, %p216_p3  ;;  %p270_p9 = scmp.lt.s32.totalorder %s1792_s29, 3 }
   0xc   : > { %s1905_s14 = scalar_select %p198_p7, %s1780_s26, %s200_s10  }
   0xd   : > { %p271_p10 = pnand %p1562_p6, %p270_p9 }
   0xe   : > { %p311_p11 = scmp.lt.s32.totalorder (!%p271_p10), %s1784_s27, 1  ;;  %s1795_s10 = smov (!%p271_p10), 112  }
   0xf   : > { %274 = sbr.rel (%p271_p10) target bundleno = 1345 (0x541), region = 48  ;;  %s1802_s18 = smov (!%p271_p10), 64  }
  0x10   : > { %s1803_s19 = smov (!%p271_p10), 32   ;;  %s1806_s20 = smov (!%p271_p10), 16  }
  0x11   : > { %s1807_s21 = smov (!%p271_p10), 48  }
  0x14   : > { %v343_v0 = vld [vmem:[%s2333_s2 + $0x38] sm:$0xff]  ;;  %v342_v1 = vld [vmem:[%s2333_s2 + $0x30] sm:$0xff]  ;;  %v341_v2 = vld [vmem:[%s2333_s2 + $0x28] sm:$0xff]  ;;  %s1921_s23 = scalar_select %p311_p11, %s1784_s27, 1  ;;  %vm348_vm0 = vcmask 523264   ;;  %v1794_v42 = vmov 0  }
  0x15   : > { %360 = vmatpush.msra.mxu0 %v343_v0  ;;  %v402_v3 = vld [vmem:[%s2335_s4 + $0xf0] sm:$0xff]  ;;  %v403_v4 = vld [vmem:[%s2335_s4 + $0xf8] sm:$0xff]  ;;  %v400_v5 = vld [vmem:[%s2335_s4 + $0xe0] sm:$0xff]  ;;  %1663 = vset.pattern.permute.xlu0 %v1794_v42  ;;  %vm329_vm5 = vcmask 130048   ;;  %vm514_vm6 = vcmask 261248   ;;  %vm807_vm7 = vcmask 523648  }
  0x16   : > { %410 = vmatpush.msra.mxu1 %v402_v3  ;;  %v401_v6 = vld [vmem:[%s2335_s4 + $0xe8] sm:$0xff]  ;;  %v340_v7 = vld [vmem:[%s2333_s2 + $0x20] sm:$0xff]  ;;  %430 = vmatpush.msra.mxu2 %v403_v4  ;;  %v398_v8 = vld [vmem:[%s2335_s4 + $0xd0] sm:$0xff]  ;;  %s1564_s15 = sshll.u32 %s1921_s23, 3  ;;  %s1796_s23 = smov 96   ;;  %vm691_vm8 = vcmask 392448  }
  0x17   : > { %361 = vmatpush.msra.mxu0 %v342_v1  ;;  %v399_v9 = vld [vmem:[%s2335_s4 + $0xd8] sm:$0xff]  ;;  %v396_v11 = vld [vmem:[%s2335_s4 + $0xc0] sm:$0xff]  ;;  %v397_v12 = vld [vmem:[%s2335_s4 + $0xc8] sm:$0xff]  ;;  %s317_s17 = scalar_lea.vmem %s2331_s0, %s1564_s15  ;;  %s324_s22 = scalar_lea.vmem %s2332_s1, %s1564_s15  ;;  %vm923_vm9 = vcmask 654848   ;;  %vm1155_vm10 = vcmask 917248   ;;  %vm1039_vm11 = vcmask 786048  }
  0x18   : > { %411 = vmatpush.msra.mxu1 %v400_v5  ;;  %v339_v10 = vld [vmem:[%s2333_s2 + $0x18] sm:$0xff]  ;;  %431 = vmatpush.msra.mxu2 %v401_v6  ;;  %v338_v13 = vld [vmem:[%s2333_s2 + $0x10] sm:$0xff]  ;;  %v337_v16 = vld [vmem:[%s2333_s2 + $0x8] sm:$0xff]  ;;  %s1797_s15 = smov 80   ;;  %vm1271_vm12 = vcmask 1048448  }
  0x19   : > { %362 = vmatpush.msra.mxu0 %v341_v2  ;;  %v394_v14 = vld [vmem:[%s2335_s4 + $0xb0] sm:$0xff]  ;;  %v395_v15 = vld [vmem:[%s2335_s4 + $0xb8] sm:$0xff]  ;;  %v392_v17 = vld [vmem:[%s2335_s4 + $0xa0] sm:$0xff] }
  0x1a   : > { %412 = vmatpush.msra.mxu1 %v398_v8  ;;  %432 = vmatpush.msra.mxu2 %v399_v9  ;;  %v393_v18 = vld [vmem:[%s2335_s4 + $0xa8] sm:$0xff]  ;;  %v336_v19 = vld [vmem:[%s2333_s2] sm:$0xff]  ;;  %v390_v20 = vld [vmem:[%s2335_s4 + $0x90] sm:$0xff] }
  0x1b   : > { %363 = vmatpush.msra.mxu0 %v340_v7  ;;  %v334_v21 = vld [vmem:[%s317_s17] sm:$0xff]  ;;  %v391_v22 = vld [vmem:[%s2335_s4 + $0x98] sm:$0xff]  ;;  %v389_v24 = vld [vmem:[%s2335_s4 + $0x88] sm:$0xff]  ;;  %v1798_v7 = vmov 4  }
  0x1c   : > { %413 = vmatpush.msra.mxu1 %v396_v11  ;;  %433 = vmatpush.msra.mxu2 %v397_v12  ;;  %v388_v23 = vld [vmem:[%s2335_s4 + $0x80] sm:$0xff]  ;;  %v386_v25 = vld [vmem:[%s2335_s4 + $0x70] sm:$0xff]  ;;  %v387_v26 = vld [vmem:[%s2335_s4 + $0x78] sm:$0xff] }
  0x1d   : > { %364 = vmatpush.msra.mxu0 %v339_v10  ;;  %v384_v27 = vld [vmem:[%s2335_s4 + $0x60] sm:$0xff]  ;;  %v385_v28 = vld [vmem:[%s2335_s4 + $0x68] sm:$0xff]  ;;  %v382_v29 = vld [vmem:[%s2335_s4 + $0x50] sm:$0xff]  ;;  %v1799_v10 = vmov 1  }
  0x1e   : > { %414 = vmatpush.msra.mxu1 %v394_v14  ;;  %434 = vmatpush.msra.mxu2 %v395_v15  ;;  %v383_v30 = vld [vmem:[%s2335_s4 + $0x58] sm:$0xff]  ;;  %v380_v31 = vld [vmem:[%s2335_s4 + $0x40] sm:$0xff]  ;;  %v381_v32 = vld [vmem:[%s2335_s4 + $0x48] sm:$0xff]  ;;  %v1801_v14 = vmov 2  }
  0x1f   : > { %365 = vmatpush.msra.mxu0 %v338_v13  ;;  %v378_v33 = vld [vmem:[%s2335_s4 + $0x30] sm:$0xff]  ;;  %v379_v34 = vld [vmem:[%s2335_s4 + $0x38] sm:$0xff]  ;;  %v376_v35 = vld [vmem:[%s2335_s4 + $0x20] sm:$0xff]  ;;  %v1800_v13 = vmov 3  }
  0x20   : > { %415 = vmatpush.msra.mxu1 %v392_v17  ;;  %435 = vmatpush.msra.mxu2 %v393_v18  ;;  %v377_v36 = vld [vmem:[%s2335_s4 + $0x28] sm:$0xff]  ;;  %v374_v37 = vld [vmem:[%s2335_s4 + $0x10] sm:$0xff]  ;;  %v375_v38 = vld [vmem:[%s2335_s4 + $0x18] sm:$0xff] }
  0x21   : > { %366 = vmatpush.msra.mxu0 %v337_v16  ;;  %v372_v39 = vld [vmem:[%s2335_s4] sm:$0xff]  ;;  %v373_v40 = vld [vmem:[%s2335_s4 + $0x8] sm:$0xff] }
  0x22   : > { %416 = vmatpush.msra.mxu1 %v390_v20  ;;  %436 = vmatpush.msra.mxu2 %v391_v22  ;;  %v335_v41 = vld [vmem:[%s324_s22] sm:$0xff] }
  0x23   : > { %367 = vmatpush.msra.mxu0 %v336_v19  ;;  %471 = vperm.xlu0 %1663, %v335_v41   ;;  %v1672_v43 = vld [vmem:[%s2334_s3] ss:$0 sm:$0xff] }
  0x24   : > { %1566 = vmatmul.msk.f32.vlgmr.msra.gmra.mxu0 %vm348_vm0, %v334_v21  ;;  %417 = vmatpush.msra.mxu1 %v388_v23  ;;  %v404_v49 = vld [vmem:[%s2336_s5] sm:$0x3] }
  0x25   : > { %437 = vmatpush.msra.mxu2 %v389_v24  ;;  %v407_v50 = vperm.slane %v404_v49, 1  ;;  %v406_v4 = vperm.slane %v404_v49, 0 }
  0x26   : > { %418 = vmatpush.msra.mxu1 %v386_v25 }
  0x27   : > { %438 = vmatpush.msra.mxu2 %v387_v26 }
  0x28   : > { %419 = vmatpush.msra.mxu1 %v384_v27 }
  0x29   : > { %439 = vmatpush.msra.mxu2 %v385_v28 }
  0x2a   : > { %420 = vmatpush.msra.mxu1 %v382_v29 }
  0x2b   : > { %440 = vmatpush.msra.mxu2 %v383_v30 }
  0x2c   : > { %421 = vmatpush.msra.mxu1 %v380_v31 }
  0x2d   : > { %441 = vmatpush.msra.mxu2 %v381_v32 }
  0x2e   : > { %422 = vmatpush.msra.mxu1 %v378_v33 }
  0x2f   : > { %442 = vmatpush.msra.mxu2 %v379_v34 }
  0x30   : > { %423 = vmatpush.msra.mxu1 %v376_v35 }
  0x31   : > { %443 = vmatpush.msra.mxu2 %v377_v36 }
  0x32   : > { %424 = vmatpush.msra.mxu1 %v374_v37 }
  0x33   : > { %444 = vmatpush.msra.mxu2 %v375_v38 }
  0x34   : > { %425 = vmatpush.msra.mxu1 %v372_v39 }
  0x35   : > { %445 = vmatpush.msra.mxu2 %v373_v40 }
  0x95   : > { %v472_v2 = vpop.permute.xlu0 %471 }
  0xa1   : > { %v369_v44 = vpop.f32.mrf.mxu0 }
  0xa2   : > { %v2045_v45 = vadd.f32 %v1672_v43, %v369_v44 }
  0xa4   : > { %561 = vrot.lane.b32.xlu1 %v2045_v45, %s1795_s10  ;;  %426 = vmatmul.f32.vlgmr.msra.gmra.mxu1 %v2045_v45 }
  0xa5   : > { %446 = vmatmul.f32.vlgmr.msra.gmra.mxu2 %v2045_v45 }
  0xac   : > { %737 = vrot.lane.b32.xlu1 %v2045_v45, %s1796_s23 }
  0xb4   : > { %853 = vrot.lane.b32.xlu1 %v2045_v45, %s1797_s15 }
  0xe9   : > { %630 = vxpose.xlu1.b32.start.end [1/1] (short) (narrow) %v2045_v45, 16 }
 0x116   : > { %v562_v46 = vpop.permute.xlu1 %561 }
 0x117   : > { %564 = vxpose.xlu0.b32.start.end [1/1] (short) (narrow) %v562_v46, 16 }
 0x11e   : > { %v738_v47 = vpop.permute.xlu1 %737 }
 0x11f   : > { %740 = vxpose.xlu2.b32.start.end [1/1] (short) (narrow) %v738_v47, 16 }
 0x121   : > { %v427_v6 = vpop.f32.mrf.mxu1 }
 0x122   : > { %v2062_v8 = vadd.f32 %v427_v6, %v406_v4  ;;  %v1808_v4 = vmov 5  }
 0x124   : > { %v476_v9 = vsel %vm329_vm5, %v2062_v8, -inf  ;;  %v515_v11 = vsel %vm514_vm6, %v2062_v8, -inf  ;;  %v808_v12 = vsel %vm807_vm7, %v2062_v8, -inf  ;;  %v692_v15 = vsel %vm691_vm8, %v2062_v8, -inf }
 0x125   : > { %v924_v16 = vsel %vm923_vm9, %v2062_v8, -inf  ;;  %v1156_v17 = vsel %vm1155_vm10, %v2062_v8, -inf  ;;  %v1040_v18 = vsel %vm1039_vm11, %v2062_v8, -inf  ;;  %v1272_v19 = vsel %vm1271_vm12, %v2062_v8, -inf }
 0x126   : > { %v854_v48 = vpop.permute.xlu1 %853 }
 0x127   : > { %856 = vxpose.xlu1.b32.start.end [1/1] (short) (narrow) %v854_v48, 16 }
 0x128   : > { %v447_v51 = vpop.f32.mrf.mxu2 }
 0x129   : > { %v448_v52 = vadd.f32 %v447_v51, %v407_v50 }
 0x12b   : > { %v450_v53 = vsub.f32 0.0, %v448_v52  ;;  %v1804_v52 = vmov 7  }
 0x12d   : > { %v451_v54 = vmul.f32 1.442695, %v450_v53 }
 0x12f   : > { %1674 = vpow2.f32 %v451_v54 }
 0x135   : > { %v1675_v55 = vpop.eup %1674 }
 0x136   : > { %v453_v56 = vadd.f32 1.0, %v1675_v55 }
 0x138   : > { %1676 = vrcp.f32 %v453_v56  ;;  %v465_v62 = vand.u32 2147483648, %v453_v56  ;;  %vm459_vm2 = vweird.f32 %v453_v56  ;;  %v463_v63 = vand.u32 2147483647, %v453_v56 }
 0x13a   : > { %v466_v1 = vor.u32 1.1754944e-38, %v465_v62  ;;  %vm464_vm4 = vcmp.eq.f32.partialorder %v463_v63, 8.507059e+37 }
 0x13e   : > { %v1677_v57 = vpop.eup %1676 }
 0x13f   : > { %v455_v58 = vmul.f32 %v1677_v57, %v453_v56  ;;  %vm460_vm1 = vweird.f32 %v1677_v57  ;;  %v1805_v56 = vmov 6  }
 0x140   : > { %vm461_vm3 = vmor %vm459_vm2, %vm460_vm1 }
 0x141   : > { %v456_v59 = vsub.f32 1.0, %v455_v58 }
 0x143   : > { %v457_v60 = vmul.f32 %v1677_v57, %v456_v59 }
 0x145   : > { %v458_v61 = vadd.f32 %v1677_v57, %v457_v60 }
 0x147   : > { %v462_v0 = vsel %vm461_vm3, %v1677_v57, %v458_v61 }
 0x148   : > { %v467_v3 = vsel %vm464_vm4, %v466_v1, %v462_v0 }
 0x149   : > { %v2059_v5 = vmul.f32 %v472_v2, %v467_v3 }
 0x17a   : > { %1664 = vset.pattern.permute.xlu1 %v1794_v42 }
 0x17e   : > { %1668 = vset.pattern.permute.xlu0 %v1798_v7 }
 0x181   : > { %1666 = vset.pattern.permute.xlu2 %v1801_v14 }
 0x189   : > { %502 = vperm.xlu1 %1664, %v2059_v5  }
 0x18d   : > { %v2088_v21 = vpop.trf.xlu1 }
 0x190   : > { %477 = vmax.xlane.f32.xlu0 %v476_v9 }
 0x191   : > { %1665 = vset.pattern.permute.xlu1 %v1799_v10 }
 0x192   : > { %544 = vperm.xlu1 %1665, %v2059_v5  }
 0x195   : > { %v2094_v24 = vpop.trf.xlu1 }
 0x198   : > { %516 = vmax.xlane.f32.xlu2 %v515_v11  ;;  %809 = vmax.xlane.f32.xlu0 %v808_v12 }
 0x19a   : > { %1667 = vset.pattern.permute.xlu1 %v1800_v13 }
 0x19b   : > { %837 = vperm.xlu1 %1667, %v2059_v5  }
 0x1a0   : > { %693 = vmax.xlane.f32.xlu2 %v692_v15  ;;  %925 = vmax.xlane.f32.xlu0 %v924_v16 }
 0x1a3   : > { %1669 = vset.pattern.permute.xlu1 %v1805_v56 }
 0x1a8   : > { %1157 = vmax.xlane.f32.xlu2 %v1156_v17  ;;  %1041 = vmax.xlane.f32.xlu0 %v1040_v18 }
 0x1b8   : > { %v2090_v22 = vpop.trf.xlu2 }
 0x1bb   : > { %v2086_v20 = vpop.trf.xlu0 }
 0x1bc   : > { %953 = vperm.xlu0 %1668, %v2059_v5  }
 0x1c0   : > { %721 = vperm.xlu2 %1666, %v2059_v5   ;;  %v2096_v25 = vpop.trf.xlu2 }
 0x1c3   : > { %v2092_v23 = vpop.trf.xlu0 }
 0x1c4   : > { %1670 = vset.pattern.permute.xlu0 %v1804_v52 }
 0x1c5   : > { %1273 = vmax.xlane.f32.xlu1 %v1272_v19 }
 0x1c8   : > { %969 = vrot.lane.b32.xlu2 %v2045_v45, %s1802_s18 }
 0x1cb   : > { %v2098_v27 = vpop.trf.xlu1 }
 0x1d3   : > { %v2102_v34 = vpop.trf.xlu1 }
 0x1fb   : > { %v2114_v44 = vpop.permute.xlu1 %502 }
 0x203   : > { %v478_v26 = vpop.xlane.xlu0 %477 }
 0x204   : > { %v2125_v51 = vpop.permute.xlu1 %544  ;;  %v479_v53 = vsub.f32 %v2062_v8, %v478_v26 }
 0x206   : > { %v480_v55 = vmul.f32 1.442695, %v479_v53 }
 0x20b   : > { %v517_v28 = vpop.xlane.xlu2 %516  ;;  %v810_v29 = vpop.xlane.xlu0 %809 }
 0x20c   : > { %v518_v30 = vsub.f32 %v2062_v8, %v517_v28  ;;  %v811_v31 = vsub.f32 %v2062_v8, %v810_v29 }
 0x20d   : > { %v2132_v54 = vpop.permute.xlu1 %837 }
 0x20e   : > { %v519_v32 = vmul.f32 1.442695, %v518_v30  ;;  %v812_v33 = vmul.f32 1.442695, %v811_v31 }
 0x210   : > { %1678 = vpow2.f32 %v519_v32 }
 0x211   : > { %1680 = vpow2.f32 %v812_v33 }
 0x213   : > { %v694_v35 = vpop.xlane.xlu2 %693  ;;  %v926_v37 = vpop.xlane.xlu0 %925 }
 0x214   : > { %v695_v36 = vsub.f32 %v2062_v8, %v694_v35  ;;  %v927_v41 = vsub.f32 %v2062_v8, %v926_v37 }
 0x216   : > { %v2105_v38 = vpop.eup %1678  ;;  %v696_v39 = vmul.f32 1.442695, %v695_v36  ;;  %v928_v42 = vmul.f32 1.442695, %v927_v41 }
 0x217   : > { %v2107_v40 = vpop.eup %1680  ;;  %522 = vrot.lane.b32.xlu2 %v2105_v38, %s1795_s10 }
 0x218   : > { %1682 = vpow2.f32 %v696_v39  ;;  %815 = vrot.lane.b32.xlu1 %v2107_v40, %s1797_s15 }
 0x219   : > { %1684 = vpow2.f32 %v928_v42 }
 0x21b   : > { %v1158_v43 = vpop.xlane.xlu2 %1157  ;;  %v1042_v59 = vpop.xlane.xlu0 %1041 }
 0x21c   : > { %v1159_v46 = vsub.f32 %v2062_v8, %v1158_v43  ;;  %v1043_v61 = vsub.f32 %v2062_v8, %v1042_v59 }
 0x21e   : > { %v2117_v47 = vpop.eup %1682  ;;  %v1160_v48 = vmul.f32 1.442695, %v1159_v46  ;;  %v1044_v63 = vmul.f32 1.442695, %v1043_v61 }
 0x21f   : > { %699 = vrot.lane.b32.xlu2 %v2117_v47, %s1796_s23  ;;  %v2121_v49 = vpop.eup %1684 }
 0x220   : > { %1686 = vpow2.f32 %v1160_v48 }
 0x221   : > { %1688 = vpow2.f32 %v480_v55 }
 0x223   : > { %v2150_v3 = vpop.permute.xlu2 %721 }
 0x226   : > { %v2123_v50 = vpop.eup %1686 }
 0x227   : > { %1163 = vrot.lane.b32.xlu0 %v2123_v50, %s1803_s19  ;;  %931 = vrot.lane.b32.xlu2 %v2121_v49, %s1802_s18  ;;  %v2136_v62 = vpop.eup %1688 }
 0x228   : > { %v482_v0 = vsel %vm329_vm5, %v2136_v62, 0.0 }
 0x22b   : > { %v970_v6 = vpop.permute.xlu2 %969 }
 0x22e   : > { %v2162_v13 = vpop.permute.xlu0 %953 }
 0x238   : > { %v1274_v57 = vpop.xlane.xlu1 %1273 }
 0x239   : > { %v1275_v58 = vsub.f32 %v2062_v8, %v1274_v57 }
 0x23b   : > { %v1276_v60 = vmul.f32 1.442695, %v1275_v58 }
 0x23d   : > { %1690 = vpow2.f32 %v1276_v60 }
 0x23e   : > { %1692 = vpow2.f32 %v1044_v63 }
 0x242   : > { %483 = vadd.xlane.f32.xlu1 %v482_v0 }
 0x243   : > { %v2140_v1 = vpop.eup %1690 }
 0x244   : > { %1279 = vrot.lane.b32.xlu0 %v2140_v1, %s1806_s20  ;;  %v2144_v2 = vpop.eup %1692 }
 0x24c   : > { %1047 = vrot.lane.b32.xlu0 %v2144_v2, %s1807_s21 }
 0x254   : > { %1301 = vperm.xlu0 %1670, %v2059_v5  }
 0x25b   : > { %1185 = vperm.xlu1 %1669, %v2059_v5  }
 0x263   : > { %1671 = vset.pattern.permute.xlu1 %v1808_v4 }
 0x264   : > { %1069 = vperm.xlu1 %1671, %v2059_v5  }
 0x26c   : > { %1201 = vrot.lane.b32.xlu1 %v2045_v45, %s1803_s19 }
 0x271   : > { %v523_v7 = vpop.permute.xlu2 %522 }
 0x272   : > { %v525_v8 = vsel %vm329_vm5, %v523_v7, 0.0 }
 0x273   : > { %526 = vadd.xlane.f32.xlu2 %v525_v8 }
 0x274   : > { %1317 = vrot.lane.b32.xlu1 %v2045_v45, %s1806_s20 }
 0x279   : > { %v700_v9 = vpop.permute.xlu2 %699 }
 0x27a   : > { %v702_v10 = vsel %vm329_vm5, %v700_v9, 0.0 }
 0x27c   : > { %1085 = vrot.lane.b32.xlu1 %v2045_v45, %s1807_s21 }
 0x27e   : > { %703 = vadd.xlane.f32.xlu0 %v702_v10 }
 0x281   : > { %v932_v12 = vpop.permute.xlu2 %931 }
 0x282   : > { %v934_v14 = vsel %vm329_vm5, %v932_v12, 0.0 }
 0x28a   : > { %v816_v11 = vpop.permute.xlu1 %815 }
 0x28b   : > { %v818_v5 = vsel %vm329_vm5, %v816_v11, 0.0 }
 0x28c   : > { %819 = vadd.xlane.f32.xlu0 %v818_v5 }
 0x294   : > { %935 = vadd.xlane.f32.xlu0 %v934_v14 }
 0x299   : > { %v1164_v15 = vpop.permute.xlu0 %1163 }
 0x29a   : > { %v1166_v16 = vsel %vm329_vm5, %v1164_v15, 0.0 }
 0x29c   : > { %1167 = vadd.xlane.f32.xlu0 %v1166_v16  ;;  %972 = vxpose.xlu2.b32.start.end [1/1] (short) (narrow) %v970_v6, 16 }
 0x2b5   : > { %v2175_v48 = vpop.xlane.xlu1 %483 }
 0x2b6   : > { %v2166_v17 = vpop.permute.xlu0 %1279 }
 0x2be   : > { %v1048_v45 = vpop.permute.xlu0 %1047 }
 0x2bf   : > { %v1050_v18 = vsel %vm329_vm5, %v1048_v45, 0.0 }
 0x2c0   : > { %1051 = vadd.xlane.f32.xlu1 %v1050_v18 }
 0x2c6   : > { %v2169_v26 = vpop.permute.xlu0 %1301 }
 0x2cd   : > { %v2179_v56 = vpop.permute.xlu1 %1185 }
 0x2d6   : > { %v2181_v7 = vpop.permute.xlu1 %1069 }
 0x2e6   : > { %v527_v19 = vpop.xlane.xlu2 %526 }
 0x2e7   : > { %1694 = vrcp.f32 %v527_v19  ;;  %v539_v31 = vand.u32 2147483648, %v527_v19  ;;  %v537_v33 = vand.u32 2147483647, %v527_v19  ;;  %vm533_vm14 = vweird.f32 %v527_v19 }
 0x2e9   : > { %v540_v37 = vor.u32 1.1754944e-38, %v539_v31  ;;  %vm538_vm0 = vcmp.eq.f32.partialorder %v537_v33, 8.507059e+37  ;;  %v1282_v33 = vsel %vm329_vm5, %v2166_v17, 0.0 }
 0x2ed   : > { %v1695_v28 = vpop.eup %1694 }
 0x2ee   : > { %v529_v29 = vmul.f32 %v1695_v28, %v527_v19  ;;  %vm534_vm13 = vweird.f32 %v1695_v28 }
 0x2ef   : > { %vm535_vm15 = vmor %vm533_vm14, %vm534_vm13 }
 0x2f0   : > { %v530_v30 = vsub.f32 1.0, %v529_v29 }
 0x2f1   : > { %v704_v35 = vpop.xlane.xlu0 %703 }
 0x2f2   : > { %v531_v32 = vmul.f32 %v1695_v28, %v530_v30  ;;  %1696 = vrcp.f32 %v704_v35  ;;  %v716_v61 = vand.u32 2147483648, %v704_v35  ;;  %vm710_vm3 = vweird.f32 %v704_v35 }
 0x2f3   : > { %v714_v4 = vand.u32 2147483647, %v704_v35 }
 0x2f4   : > { %v532_v36 = vadd.f32 %v1695_v28, %v531_v32  ;;  %v717_v5 = vor.u32 1.1754944e-38, %v716_v61 }
 0x2f6   : > { %v536_v39 = vsel %vm535_vm15, %v1695_v28, %v532_v36  ;;  %vm715_vm15 = vcmp.eq.f32.partialorder %v714_v4, 8.507059e+37 }
 0x2f7   : > { %v541_v41 = vsel %vm538_vm0, %v540_v37, %v536_v39 }
 0x2f8   : > { %v542_v42 = vmul.f32 %v2105_v38, %v541_v41  ;;  %v1697_v46 = vpop.eup %1696 }
 0x2f9   : > { %v706_v52 = vmul.f32 %v1697_v46, %v704_v35  ;;  %vm711_vm1 = vweird.f32 %v1697_v46 }
 0x2fa   : > { %v2173_v43 = vmul.f32 %v2125_v51, %v542_v42  ;;  %vm2183_vm4 = vmor %vm710_vm3, %vm711_vm1 }
 0x2fb   : > { %v707_v55 = vsub.f32 1.0, %v706_v52 }
 0x2fc   : > { %597 = vrot.lane.b32.xlu1 %v2173_v43, %s1795_s10 }
 0x2fd   : > { %v708_v58 = vmul.f32 %v1697_v46, %v707_v55 }
 0x2ff   : > { %v820_v53 = vpop.xlane.xlu0 %819  ;;  %v709_v51 = vadd.f32 %v1697_v46, %v708_v58 }
 0x300   : > { %1698 = vrcp.f32 %v820_v53  ;;  %v832_v0 = vand.u32 2147483648, %v820_v53  ;;  %v830_v6 = vand.u32 2147483647, %v820_v53  ;;  %vm826_vm13 = vweird.f32 %v820_v53 }
 0x301   : > { %v713_v11 = vsel %vm2183_vm4, %v1697_v46, %v709_v51 }
 0x302   : > { %v833_v12 = vor.u32 1.1754944e-38, %v832_v0  ;;  %vm831_vm0 = vcmp.eq.f32.partialorder %v830_v6, 8.507059e+37  ;;  %v718_v19 = vsel %vm715_vm15, %v717_v5, %v713_v11 }
 0x303   : > { %v719_v35 = vmul.f32 %v2117_v47, %v718_v19 }
 0x305   : > { %v724_v46 = vmul.f32 %v2150_v3, %v719_v35 }
 0x306   : > { %v1699_v57 = vpop.eup %1698 }
 0x307   : > { %v822_v59 = vmul.f32 %v1699_v57, %v820_v53  ;;  %v936_v60 = vpop.xlane.xlu0 %935  ;;  %vm827_vm2 = vweird.f32 %v1699_v57  ;;  %v725_v58 = vsel %vm691_vm8, %v724_v46, 0.0 }
 0x308   : > { %1700 = vrcp.f32 %v936_v60  ;;  %vm828_vm14 = vmor %vm826_vm13, %vm827_vm2  ;;  %v948_v28 = vand.u32 2147483648, %v936_v60  ;;  %v946_v31 = vand.u32 2147483647, %v936_v60  ;;  %vm942_vm2 = vweird.f32 %v936_v60 }
 0x309   : > { %v823_v38 = vsub.f32 1.0, %v822_v59  ;;  %v726_v3 = vrot.slane %v725_v58, 4 }
 0x30a   : > { %v949_v39 = vor.u32 1.1754944e-38, %v948_v28  ;;  %vm947_vm4 = vcmp.eq.f32.partialorder %v946_v31, 8.507059e+37 }
 0x30b   : > { %v824_v63 = vmul.f32 %v1699_v57, %v823_v38  ;;  %v727_v0 = vadd.f32 %v726_v3, %v725_v58 }
 0x30d   : > { %v825_v9 = vadd.f32 %v1699_v57, %v824_v63  ;;  %v728_v6 = vrot.slane %v727_v0, 2 }
 0x30e   : > { %v1701_v10 = vpop.eup %1700 }
 0x30f   : > { %v938_v14 = vmul.f32 %v1701_v10, %v936_v60  ;;  %v1168_v15 = vpop.xlane.xlu0 %1167  ;;  %v829_v16 = vsel %vm828_vm14, %v1699_v57, %v825_v9  ;;  %vm943_vm1 = vweird.f32 %v1701_v10 }
 0x310   : > { %1702 = vrcp.f32 %v1168_v15  ;;  %v834_v18 = vsel %vm831_vm0, %v833_v12, %v829_v16  ;;  %vm944_vm3 = vmor %vm942_vm2, %vm943_vm1  ;;  %v1180_v52 = vand.u32 2147483648, %v1168_v15  ;;  %v1178_v55 = vand.u32 2147483647, %v1168_v15 }
 0x311   : > { %v939_v45 = vsub.f32 1.0, %v938_v14  ;;  %v835_v29 = vmul.f32 %v2107_v40, %v834_v18  ;;  %v2198_v40 = vpop.permute.xlu1 %1201  ;;  %vm1174_vm14 = vweird.f32 %v1168_v15 }
 0x312   : > { %v1181_v60 = vor.u32 1.1754944e-38, %v1180_v52  ;;  %vm1179_vm0 = vcmp.eq.f32.partialorder %v1178_v55, 8.507059e+37 }
 0x313   : > { %v940_v30 = vmul.f32 %v1701_v10, %v939_v45  ;;  %v2191_v32 = vmul.f32 %v2132_v54, %v835_v29 }
 0x315   : > { %v941_v36 = vadd.f32 %v1701_v10, %v940_v30  ;;  %1283 = vadd.xlane.f32.xlu2 %v1282_v33  ;;  %889 = vrot.lane.b32.xlu0 %v2191_v32, %s1797_s15 }
 0x316   : > { %v1703_v37 = vpop.eup %1702 }
 0x317   : > { %v1170_v41 = vmul.f32 %v1703_v37, %v1168_v15  ;;  %v945_v54 = vsel %vm944_vm3, %v1701_v10, %v941_v36  ;;  %vm1175_vm13 = vweird.f32 %v1703_v37  ;;  %v729_v10 = vadd.f32 %v728_v6, %v727_v0 }
 0x318   : > { %v950_v42 = vsel %vm947_vm4, %v949_v39, %v945_v54  ;;  %vm1176_vm15 = vmor %vm1174_vm14, %vm1175_vm13  ;;  %v548_v15 = vsel %vm514_vm6, %v2173_v43, 0.0  ;;  %vm490_vm3 = vweird.f32 %v2175_v48  ;;  %vm600_vm14 = vcmask 64512  }
 0x319   : > { %v1171_v17 = vsub.f32 1.0, %v1170_v41  ;;  %v951_v47 = vmul.f32 %v2121_v49, %v950_v42  ;;  %v1318_v61 = vpop.permute.xlu1 %1317  ;;  %v730_v11 = vrot.slane %v729_v10, 1  ;;  %v549_v45 = vrot.slane %v548_v15, 4 }
 0x31b   : > { %v1172_v53 = vmul.f32 %v1703_v37, %v1171_v17  ;;  %v956_v57 = vmul.f32 %v2162_v13, %v951_v47  ;;  %v731_v12 = vadd.f32 %v730_v11, %v729_v10  ;;  %v550_v30 = vadd.f32 %v549_v45, %v548_v15 }
 0x31c   : > { %v841_v15 = vsel %vm807_vm7, %v2191_v32, 0.0  ;;  %vm332_vm7 = vcmask 122880  }
 0x31d   : > { %v1173_v59 = vadd.f32 %v1703_v37, %v1172_v53  ;;  %1005 = vrot.lane.b32.xlu1 %v956_v57, %s1802_s18  ;;  %v957_v13 = vsel %vm923_vm9, %v956_v57, 0.0  ;;  %v551_v39 = vrot.slane %v550_v30, 2 }
 0x31e   : > { %v958_v4 = vrot.slane %v957_v13, 4 }
 0x31f   : > { %v1177_v38 = vsel %vm1176_vm15, %v1703_v37, %v1173_v59  ;;  %v552_v42 = vadd.f32 %v551_v39, %v550_v30 }
 0x320   : > { %v1182_v51 = vsel %vm1179_vm0, %v1181_v60, %v1177_v38  ;;  %v959_v9 = vadd.f32 %v958_v4, %v957_v13 }
 0x321   : > { %v1183_v49 = vmul.f32 %v2123_v50, %v1182_v51  ;;  %v2212_v8 = vpop.permute.xlu1 %1085 }
 0x322   : > { %v960_v5 = vrot.slane %v959_v9, 2 }
 0x323   : > { %v2207_v63 = vmul.f32 %v2179_v56, %v1183_v49 }
 0x324   : > { %v961_v56 = vadd.f32 %v960_v5, %v959_v9 }
 0x325   : > { %1237 = vrot.lane.b32.xlu0 %v2207_v63, %s1803_s19 }
 0x326   : > { %v962_v14 = vrot.slane %v961_v56, 1 }
 0x328   : > { %v963_v19 = vadd.f32 %v962_v14, %v961_v56 }
 0x32d   : > { %773 = vrot.lane.b32.xlu2 %v724_v46, %s1796_s23  ;;  %v553_v46 = vrot.slane %v552_v42, 1 }
 0x32f   : > { %v554_v17 = vadd.f32 %v553_v46, %v552_v42 }
 0x333   : > { %v1052_v50 = vpop.xlane.xlu1 %1051 }
 0x334   : > { %1704 = vrcp.f32 %v1052_v50  ;;  %v1064_v29 = vand.u32 2147483648, %v1052_v50  ;;  %v1062_v33 = vand.u32 2147483647, %v1052_v50  ;;  %vm1058_vm9 = vweird.f32 %v1052_v50 }
 0x335   : > { %733 = vrot.lane.b32.xlu2 %v731_v12, %s1796_s23  ;;  %1706 = vrcp.f32 %v2175_v48 }
 0x336   : > { %v1065_v36 = vor.u32 1.1754944e-38, %v1064_v29  ;;  %vm1063_vm2 = vcmp.eq.f32.partialorder %v1062_v33, 8.507059e+37  ;;  %v1189_v33 = vsel %vm1155_vm10, %v2207_v63, 0.0 }
 0x33a   : > { %v1705_v16 = vpop.eup %1704 }
 0x33b   : > { %v1054_v18 = vmul.f32 %v1705_v16, %v1052_v50  ;;  %vm1059_vm8 = vweird.f32 %v1705_v16  ;;  %v1707_v47 = vpop.eup %1706 }
 0x33c   : > { %vm1060_vm1 = vmor %vm1058_vm9, %vm1059_vm8  ;;  %v486_v52 = vmul.f32 %v1707_v47, %v2175_v48  ;;  %vm491_vm6 = vweird.f32 %v1707_v47 }
 0x33d   : > { %v1055_v28 = vsub.f32 1.0, %v1054_v18  ;;  %965 = vrot.lane.b32.xlu2 %v963_v19, %s1802_s18  ;;  %vm492_vm4 = vmor %vm490_vm3, %vm491_vm6 }
 0x33e   : > { %v487_v53 = vsub.f32 1.0, %v486_v52 }
 0x33f   : > { %v1056_v31 = vmul.f32 %v1705_v16, %v1055_v28 }
 0x340   : > { %v488_v55 = vmul.f32 %v1707_v47, %v487_v53 }
 0x341   : > { %v1057_v35 = vadd.f32 %v1705_v16, %v1056_v31 }
 0x342   : > { %v489_v57 = vadd.f32 %v1707_v47, %v488_v55 }
 0x343   : > { %v1061_v37 = vsel %vm1060_vm1, %v1705_v16, %v1057_v35  ;;  %v842_v16 = vrot.slane %v841_v15, 4  ;;  %v1190_v35 = vrot.slane %v1189_v33, 4 }
 0x344   : > { %v1066_v43 = vsel %vm1063_vm2, %v1065_v36, %v1061_v37  ;;  %v493_v58 = vsel %vm492_vm4, %v1707_v47, %v489_v57 }
 0x345   : > { %v1067_v41 = vmul.f32 %v2144_v2, %v1066_v43  ;;  %v496_v2 = vand.u32 2147483648, %v2175_v48  ;;  %v843_v18 = vadd.f32 %v842_v16, %v841_v15  ;;  %v1191_v43 = vadd.f32 %v1190_v35, %v1189_v33 }
 0x347   : > { %v2221_v54 = vmul.f32 %v2181_v7, %v1067_v41  ;;  %v494_v7 = vand.u32 2147483647, %v2175_v48  ;;  %v497_v59 = vor.u32 1.1754944e-38, %v496_v2  ;;  %v988_v48 = vpop.trf.xlu2  ;;  %v844_v28 = vrot.slane %v843_v18, 2 }
 0x348   : > { %v1192_v46 = vrot.slane %v1191_v43, 2 }
 0x349   : > { %1121 = vrot.lane.b32.xlu1 %v2221_v54, %s1807_s21  ;;  %vm495_vm13 = vcmp.eq.f32.partialorder %v494_v7, 8.507059e+37  ;;  %v845_v31 = vadd.f32 %v844_v28, %v843_v18 }
 0x34a   : > { %v498_v60 = vsel %vm495_vm13, %v497_v59, %v493_v58  ;;  %v1193_v47 = vadd.f32 %v1192_v46, %v1191_v43  ;;  %v1809_v59 = vmov 0.0  }
 0x34b   : > { %v499_v38 = vmul.f32 %v2136_v62, %v498_v60  ;;  %v846_v36 = vrot.slane %v845_v31, 1  ;;  %333 = vst.msk [vmem:[#allocation3] sm:$0x1] %vm332_vm7, %v1809_v59 }
 0x34c   : > { %v1194_v63 = vrot.slane %v1193_v47, 1  ;;  %330 = vst.msk [vmem:[#allocation2] sm:$0xff] %vm329_vm5, %v1809_v59 }
 0x34d   : > { %v2233_v51 = vmul.f32 %v2114_v44, %v499_v38  ;;  %v847_v41 = vadd.f32 %v846_v36, %v845_v31  ;;  %331 = vst.msk [vmem:[#allocation2 + $0x8] sm:$0xff] %vm329_vm5, %v1809_v59 }
 0x34e   : > { %v1195_v53 = vadd.f32 %v1194_v63, %v1193_v47  ;;  %v1401_v47 = vld [vmem:[%s2337_s6] sm:$0xff] }
 0x34f   : > { %v989_v62 = vpop.trf.xlu2  ;;  %v506_v58 = vsel %vm329_vm5, %v2233_v51, 0.0 }
 0x350   : > { %v507_v60 = vrot.slane %v506_v58, 4 }
 0x351   : > { %556 = vrot.lane.b32.xlu1 %v554_v17, %s1795_s10  ;;  %s308_s10 = sand.u32 1, %s1776_s25  }
 0x352   : > { %v508_v38 = vadd.f32 %v507_v60, %v506_v58  ;;  %s1563_s23 = sshll.u32 %s308_s10, 4 }
 0x363   : > { %1320 = vxpose.xlu2.b32.start.end [1/1] (short) (narrow) %v1318_v61, 16 }
 0x36e   : > { %v598_v3 = vpop.permute.xlu1 %597 }
 0x36f   : > { %622 = vmatpush.msrb.mxu0 %v598_v3  ;;  %1589 = vmatpush.msra.mxu3 %v598_v3  ;;  %v509_v3 = vrot.slane %v508_v38, 2 }
 0x370   : > { %1567 = vmatmul.msk.f32.vlgmr.msrb.gmra.mxu0 %vm600_vm14, %v2086_v20  ;;  %1568 = vmatmul.msk.f32.vlgmr.msra.gmra.mxu3 %vm600_vm14, %v2092_v23 }
 0x371   : > { %683 = vmatpush.msrb.mxu3 %v2233_v51 }
 0x378   : > { %1569 = vmatmul.msk.f32.vlgmr.msrb.gmra.mxu3 %vm600_vm14, %v2088_v21 }
 0x380   : > { %1570 = vmatmul.msk.f32.gmra.mxu3 %vm600_vm14, %v2094_v24 }
 0x386   : > { %1088 = vxpose.xlu1.b32.start.end [1/1] (short) (narrow) %v2212_v8, 16 }
 0x387   : > { %v890_v44 = vpop.permute.xlu0 %889 }
 0x388   : > { %v1284_v61 = vpop.xlane.xlu2 %1283  ;;  %913 = vmatpush.msra.mxu3 %v890_v44 }
 0x389   : > { %1708 = vrcp.f32 %v1284_v61  ;;  %1573 = vmatmul.msk.f32.vlgmr.msra.gmra.mxu3 %vm600_vm14, %v2098_v27  ;;  %v1296_v21 = vand.u32 2147483648, %v1284_v61  ;;  %v1294_v4 = vand.u32 2147483647, %v1284_v61  ;;  %vm1290_vm0 = vweird.f32 %v1284_v61 }
 0x38b   : > { %v1297_v27 = vor.u32 1.1754944e-38, %v1296_v21  ;;  %vm1295_vm9 = vcmp.eq.f32.partialorder %v1294_v4, 8.507059e+37 }
 0x38f   : > { %v1709_v20 = vpop.eup %1708  ;;  %v1006_v13 = vpop.permute.xlu1 %1005 }
 0x390   : > { %v1286_v23 = vmul.f32 %v1709_v20, %v1284_v61  ;;  %v774_v49 = vpop.permute.xlu2 %773  ;;  %vm1291_vm15 = vweird.f32 %v1709_v20 }
 0x391   : > { %797 = vmatpush.msra.mxu0 %v774_v49  ;;  %1574 = vmatmul.msk.f32.gmra.mxu3 %vm600_vm14, %v2102_v34  ;;  %vm1292_vm8 = vmor %vm1290_vm0, %vm1291_vm15 }
 0x392   : > { %v1287_v0 = vsub.f32 1.0, %v1286_v23  ;;  %1571 = vmatmul.msk.f32.vlgmr.msra.gmra.mxu0 %vm600_vm14, %v2090_v22 }
 0x393   : > { %1029 = vmatpush.msrb.mxu0 %v1006_v13 }
 0x394   : > { %v1288_v24 = vmul.f32 %v1709_v20, %v1287_v0 }
 0x396   : > { %v1289_v6 = vadd.f32 %v1709_v20, %v1288_v24 }
 0x397   : > { %v1238_v8 = vpop.permute.xlu0 %1237 }
 0x398   : > { %1261 = vmatpush.msrb.mxu2 %v1238_v8  ;;  %v1293_v9 = vsel %vm1292_vm8, %v1709_v20, %v1289_v6  ;;  %v734_v39 = vpop.permute.xlu2 %733 }
 0x399   : > { %v1298_v10 = vsel %vm1295_vm9, %v1297_v27, %v1293_v9  ;;  %v1393_v27 = vld [vmem:[#allocation3] sm:$0x1] }
 0x39a   : > { %1572 = vmatmul.msk.f32.gmra.mxu0 %vm600_vm14, %v2096_v25  ;;  %v1299_v34 = vmul.f32 %v2140_v1, %v1298_v10 }
 0x39c   : > { %v1304_v22 = vmul.f32 %v2169_v26, %v1299_v34 }
 0x39e   : > { %1353 = vrot.lane.b32.xlu0 %v1304_v22, %s1806_s20  ;;  %v1305_v5 = vsel %vm1271_vm12, %v1304_v22, 0.0 }
 0x39f   : > { %v1306_v50 = vrot.slane %v1305_v5, 4 }
 0x3a0   : > { %v966_v52 = vpop.permute.xlu2 %965 }
 0x3a1   : > { %v1307_v12 = vadd.f32 %v1306_v50, %v1305_v5 }
 0x3a2   : > { %1575 = vmatmul.msk.f32.vlgmr.msrb.gmra.mxu0 %vm600_vm14, %v988_v48  ;;  %v510_v48 = vadd.f32 %v509_v3, %v508_v38 }
 0x3a3   : > { %v1308_v56 = vrot.slane %v1307_v12, 2 }
 0x3a5   : > { %v1309_v25 = vadd.f32 %v1308_v56, %v1307_v12 }
 0x3a7   : > { %v1310_v14 = vrot.slane %v1309_v25, 1 }
 0x3a9   : > { %v1311_v1 = vadd.f32 %v1310_v14, %v1309_v25 }
 0x3aa   : > { %1576 = vmatmul.msk.f32.gmra.mxu0 %vm600_vm14, %v989_v62  ;;  %v511_v62 = vrot.slane %v510_v48, 1 }
 0x3ac   : > { %v512_v61 = vadd.f32 %v511_v62, %v510_v48 }
 0x3bb   : > { %v1122_v11 = vpop.permute.xlu1 %1121 }
 0x3bc   : > { %1145 = vmatpush.msrb.mxu1 %v1122_v11 }
 0x3c0   : > { %1204 = vxpose.xlu0.b32.start.end [1/1] (short) (narrow) %v2198_v40, 16  ;;  %v1073_v40 = vsel %vm1039_vm11, %v2221_v54, 0.0 }
 0x3c1   : > { %v1074_v19 = vrot.slane %v1073_v40, 4 }
 0x3c3   : > { %v557_v45 = vpop.permute.xlu1 %556  ;;  %v1075_v30 = vadd.f32 %v1074_v19, %v1073_v40 }
 0x3c4   : > { %v559_v20 = vadd.f32 %v557_v45, %v512_v61 }
 0x3c5   : > { %v1076_v37 = vrot.slane %v1075_v30, 2 }
 0x3c6   : > { %v736_v23 = vadd.f32 %v734_v39, %v559_v20 }
 0x3c7   : > { %v1077_v54 = vadd.f32 %v1076_v37, %v1075_v30  ;;  %v1387_v30 = vld [vmem:[#allocation2] sm:$0xff] }
 0x3c9   : > { %v1078_v42 = vrot.slane %v1077_v54, 1 }
 0x3cb   : > { %v1079_v17 = vadd.f32 %v1078_v42, %v1077_v54  ;;  %v1388_v54 = vld [vmem:[#allocation2 + $0x8] sm:$0xff] }
 0x3e8   : > { %1313 = vrot.lane.b32.xlu1 %v1311_v1, %s1806_s20 }
 0x3ed   : > { %v624_v34 = vpop.f32.mrf.mxu0 }
 0x3f3   : > { %v627_v51 = vpop.f32.mrf.mxu3 }
 0x3fb   : > { %v685_v10 = vpop.f32.mrf.mxu3 }
 0x3fc   : > { %v1336_v55 = vpop.trf.xlu2  ;;  %v686_v12 = vadd.f32 %v685_v10, %v624_v34 }
 0x403   : > { %v688_v22 = vpop.f32.mrf.mxu3 }
 0x404   : > { %v1337_v57 = vpop.trf.xlu2  ;;  %v689_v15 = vadd.f32 %v688_v22, %v627_v51 }
 0x40c   : > { %v915_v5 = vpop.f32.mrf.mxu3 }
 0x40f   : > { %v799_v11 = vpop.f32.mrf.mxu0 }
 0x410   : > { %v1354_v26 = vpop.permute.xlu0 %1353  ;;  %v805_v25 = vadd.f32 %v799_v11, %v686_v12 }
 0x411   : > { %1377 = vmatpush.msrb.mxu3 %v1354_v26 }
 0x412   : > { %1581 = vmatmul.msk.f32.vlgmr.msrb.gmra.mxu3 %vm600_vm14, %v1336_v55  ;;  %v921_v26 = vadd.f32 %v915_v5, %v805_v25 }
 0x414   : > { %v918_v56 = vpop.f32.mrf.mxu3 }
 0x417   : > { %v802_v50 = vpop.f32.mrf.mxu0 }
 0x418   : > { %v806_v18 = vadd.f32 %v802_v50, %v689_v15 }
 0x41a   : > { %1582 = vmatmul.msk.f32.gmra.mxu3 %vm600_vm14, %v1337_v57  ;;  %v922_v31 = vadd.f32 %v918_v56, %v806_v18 }
 0x41f   : > { %v1031_v14 = vpop.f32.mrf.mxu0 }
 0x420   : > { %v1037_v16 = vadd.f32 %v1031_v14, %v921_v26 }
 0x42a   : > { %v1104_v29 = vpop.trf.xlu1 }
 0x42b   : > { %1577 = vmatmul.msk.f32.vlgmr.msrb.gmra.mxu1 %vm600_vm14, %v1104_v29  ;;  %v1034_v29 = vpop.f32.mrf.mxu0 }
 0x42c   : > { %v1038_v36 = vadd.f32 %v1034_v29, %v922_v31 }
 0x432   : > { %v1105_v32 = vpop.trf.xlu1 }
 0x433   : > { %1578 = vmatmul.msk.f32.gmra.mxu1 %vm600_vm14, %v1105_v32 }
 0x436   : > { %849 = vrot.lane.b32.xlu0 %v847_v41, %s1797_s15  ;;  %s1588_s15 = sshll.u32 %s1784_s27, 4  ;;  %s1455_s27 = scalar_lea.sflag [#allocation5], %s308_s10 }
 0x437   : > { %s1466_s18 = scalar_lea.hbm %s2338_s7, %s1588_s15 }
 0x43e   : > { %1081 = vrot.lane.b32.xlu0 %v1079_v17, %s1807_s21  ;;  %s1469_s21 = sshll.u32 %s1466_s18, 4  ;;  %s1470_s21 = int_to_ptr.hbm [resolvable:$true] %s1469_s21 }
 0x43f   : > { %s1728_s17 = sshra.s32 %s1470_s21, 4  ;;  %s1729_s17 = int_to_ptr.hbm [resolvable:$true] %s1728_s17 }
 0x440   : > { %s1730_s22 = scalar_lea.hbm %s1729_s17, 16  ;;  %p1735_p1 = scmp.lt.s32.totalorder %s1729_s17, %s2338_s7 }
 0x441   : > { %p1731_p12 = scmp.ne.s32.totalorder %s1729_s17, %s1730_s22 }
 0x443   : > { %p1732_p13 = pnand %p1731_p12, %p1892_p4 }
 0x445   : > { %p1733_p0 = pneg %p1732_p13 }
 0x446   : > { %1197 = vrot.lane.b32.xlu0 %v1195_v53, %s1803_s19  ;;  %v1402_v53 = vld [vmem:[%s2337_s6 + $0x8] sm:$0xff]  ;;  %s310_s19 = scalar_lea.vmem [#allocation4], %s1563_s23  ;;  %s1734_s23 = scalar_lea.hbm %s2338_s7, 32 }
 0x447   : > { %s1467_s20 = sshll.u32 %s310_s19, 4  ;;  %p1736_p2 = scmp.lt.s32.totalorder %s1734_s23, %s1730_s22  ;;  %s1468_s20 = int_to_ptr.vmem [resolvable:$true] %s1467_s20 }
 0x449   : > { %p1737_p3 = por %p1736_p2, %p1735_p1 }
 0x44b   : > { %p1738_p5 = pnand %p1737_p3, %p1733_p0 }
 0x45a   : > { %v1314_v6 = vpop.permute.xlu1 %1313 }
 0x464   : > { %v1220_v2 = vpop.trf.xlu0 }
 0x465   : > { %1579 = vmatmul.msk.f32.vlgmr.msrb.gmra.mxu2 %vm600_vm14, %v1220_v2 }
 0x46c   : > { %v1221_v7 = vpop.trf.xlu0 }
 0x46d   : > { %1580 = vmatmul.msk.f32.gmra.mxu2 %vm600_vm14, %v1221_v7 }
 0x495   : > { %v1379_v45 = vpop.f32.mrf.mxu3 }
 0x49d   : > { %v1382_v43 = vpop.f32.mrf.mxu3 }
 0x4a8   : > { %v850_v44 = vpop.permute.xlu0 %849  ;;  %v1147_v1 = vpop.f32.mrf.mxu1 }
 0x4a9   : > { %v852_v0 = vadd.f32 %v850_v44, %v736_v23  ;;  %v1153_v40 = vadd.f32 %v1147_v1, %v1037_v16 }
 0x4ab   : > { %v968_v13 = vadd.f32 %v966_v52, %v852_v0 }
 0x4b0   : > { %v1082_v49 = vpop.permute.xlu0 %1081  ;;  %v1150_v35 = vpop.f32.mrf.mxu1 }
 0x4b1   : > { %v1084_v21 = vadd.f32 %v1082_v49, %v968_v13  ;;  %v1154_v32 = vadd.f32 %v1150_v35, %v1038_v36 }
 0x4b8   : > { %v1198_v24 = vpop.permute.xlu0 %1197 }
 0x4b9   : > { %v1200_v4 = vadd.f32 %v1198_v24, %v1084_v21 }
 0x4bb   : > { %v1316_v8 = vadd.f32 %v1314_v6, %v1200_v4 }
 0x4bd   : > { %v1394_v9 = vadd.f32 %v1393_v27, %v1316_v8 }
 0x4bf   : > { %1396 = vst.msk [vmem:[#allocation3] sm:$0x1] %vm332_vm7, %v1394_v9 }
 0x4c6   : > { %v1673_v17 = vld [vmem:[#allocation3] ss:$0 sm:$0xff] }
 0x4c7   : > { %v1406_v63 = vmul.f32 %v1673_v17, %v1401_v47  ;;  %v1407_v57 = vmul.f32 %v1673_v17, %v1402_v53 }
 0x4e8   : > { %v1263_v19 = vpop.f32.mrf.mxu2 }
 0x4e9   : > { %v1269_v28 = vadd.f32 %v1263_v19, %v1153_v40 }
 0x4eb   : > { %v1385_v33 = vadd.f32 %v1379_v45, %v1269_v28 }
 0x4ed   : > { %v1389_v37 = vadd.f32 %v1387_v30, %v1385_v33 }
 0x4ef   : > { %1391 = vst.msk [vmem:[#allocation2] sm:$0xff] %vm329_vm5, %v1389_v37 }
 0x4f0   : > { %v1266_v39 = vpop.f32.mrf.mxu2 }
 0x4f1   : > { %v1270_v41 = vadd.f32 %v1266_v39, %v1154_v32 }
 0x4f3   : > { %v1386_v42 = vadd.f32 %v1382_v43, %v1270_v41 }
 0x4f5   : > { %v1390_v46 = vadd.f32 %v1388_v54, %v1386_v42 }
 0x4f6   : > { %v1408_v52 = vld [vmem:[#allocation2] sm:$0xff] }
 0x4f7   : > { %1392 = vst.msk [vmem:[#allocation2 + $0x8] sm:$0xff] %vm329_vm5, %v1390_v46  ;;  %v1410_v55 = vsub.f32 %v1408_v52, %v1406_v63 }
 0x4f9   : > { %v1412_v58 = vmul.f32 %v1410_v55, %v1410_v55 }
 0x4fb   : > { %v1414_v60 = vsel %vm329_vm5, %v1412_v58, 0.0 }
 0x4fe   : > { %v1409_v2 = vld [vmem:[#allocation2 + $0x8] sm:$0xff] }
 0x4ff   : > { %v1411_v7 = vsub.f32 %v1409_v2, %v1407_v57 }
 0x501   : > { %v1413_v59 = vmul.f32 %v1411_v7, %v1411_v7 }
 0x503   : > { %v1415_v38 = vsel %vm329_vm5, %v1413_v59, 0.0 }
 0x504   : > { %v1416_v3 = vadd.f32 %v1415_v38, %v1414_v60 }
 0x506   : > { %v1417_v48 = vrot.slane %v1416_v3, 4 }
 0x508   : > { %v1418_v62 = vadd.f32 %v1417_v48, %v1416_v3 }
 0x50a   : > { %v1419_v44 = vrot.slane %v1418_v62, 2 }
 0x50c   : > { %v1420_v61 = vadd.f32 %v1419_v44, %v1418_v62 }
 0x50e   : > { %v1421_v20 = vrot.slane %v1420_v61, 1 }
 0x510   : > { %v1422_v23 = vadd.f32 %v1421_v20, %v1420_v61 }
 0x512   : > { %1710 = vrsqrt.f32 %v1422_v23  ;;  %vm1430_vm10 = vcmp.eq.f32.partialorder %v1422_v23, inf  ;;  %v1433_v6 = vand.u32 2147483648, %v1422_v23  ;;  %vm1432_vm11 = vcmp.eq.f32.partialorder %v1422_v23, 0.0 }
 0x518   : > { %v1711_v49 = vpop.eup %1710 }
 0x519   : > { %v1424_v0 = vmul.f32 %v1711_v49, %v1422_v23 }
 0x51b   : > { %v1425_v13 = vmul.f32 %v1711_v49, %v1424_v0 }
 0x51d   : > { %v1426_v51 = vmul.f32 0.5, %v1425_v13 }
 0x51f   : > { %v1427_v21 = vsub.f32 1.5, %v1426_v51 }
 0x521   : > { %v1428_v24 = vmul.f32 %v1711_v49, %v1427_v21 }
 0x523   : > { %v1429_v4 = vmul.f32 %v1428_v24, %v1422_v23 }
 0x525   : > { %v1431_v27 = vsel %vm1430_vm10, %v1422_v23, %v1429_v4 }
 0x526   : > { %v1434_v8 = vsel %vm1432_vm11, %v1433_v6, %v1431_v27 }
 0x527   : > { %v1435_v9 = vmax.f32 %v1434_v8, 1e-12 }
 0x529   : > { %1712 = vrcp.f32 %v1435_v9  ;;  %v1447_v11 = vand.u32 2147483648, %v1435_v9  ;;  %v1445_v50 = vand.u32 2147483647, %v1435_v9  ;;  %vm1441_vm1 = vweird.f32 %v1435_v9 }
 0x52b   : > { %v1448_v56 = vor.u32 1.1754944e-38, %v1447_v11  ;;  %vm1446_vm6 = vcmp.eq.f32.partialorder %v1445_v50, 8.507059e+37 }
 0x52f   : > { %v1713_v10 = vpop.eup %1712 }
 0x530   : > { %v1437_v34 = vmul.f32 %v1713_v10, %v1435_v9  ;;  %vm1442_vm12 = vweird.f32 %v1713_v10 }
 0x531   : > { %vm1443_vm2 = vmor %vm1441_vm1, %vm1442_vm12 }
 0x532   : > { %v1438_v22 = vsub.f32 1.0, %v1437_v34 }
 0x534   : > { %v1439_v5 = vmul.f32 %v1713_v10, %v1438_v22 }
 0x536   : > { %v1440_v12 = vadd.f32 %v1713_v10, %v1439_v5 }
 0x538   : > { %v1444_v25 = vsel %vm1443_vm2, %v1713_v10, %v1440_v12 }
 0x539   : > { %v1449_v14 = vsel %vm1446_vm6, %v1448_v56, %v1444_v25 }
 0x53a   : > { %v1450_v1 = vmul.f32 %v1449_v14, %v1410_v55  ;;  %v1451_v26 = vmul.f32 %v1449_v14, %v1411_v7 }
 0x53c   : > { %1452 = vst.msk [vmem:[%s310_s19] sm:$0xff] %vm329_vm5, %v1450_v1 }
 0x53d   : > { %1453 = vst.msk [vmem:[%s310_s19 + $0x8] sm:$0xff] %vm329_vm5, %v1451_v26 }
 0x53e   : > { %1741 = shalt.err (!%p1738_p5)
}
 0x53f   : > { %s1810_s10 = smov 128   ;;  %s1811_s16 = smov 8  }
 0x540   : > { %1590 = dma.vmem_to_hbm [thread:$0]  (%p1892_p4), %s1468_s20, 256, %s1470_s21, %s1455_s27, %s1810_s10, %s1810_s10, %s1811_s16  }
 0x541 PF: > { %p1596_p6 = scmp.ge.s32.totalorder %s1792_s29, 2  ;;  %s1484_s18 = sand.u32 1, %s1772_s24  }
 0x542   : > { %s1485_s19 = scalar_lea.sflag [#allocation5], %s1484_s18 }
 0x543   : > { %p1593_p7 = pnand %p1596_p6, %p1899_p8 }
 0x545   : > { %p1594_p9 = pneg %p1593_p7 }
 0x547   : > { %1767 = dma.done.wait (%p1594_p9), %s1485_s19, 256  }
 0x548   : > { %1769 = vsyncadd (%p1594_p9), %s1485_s19, 4294967040  ;;  %s20_s29 = sadd.s32 1, %s1792_s29   ;;  %s2343_s24 = smov %s1776_s25 }
 0x549   : > { %p17_p10 = scmp.ge.s32.totalorder %s20_s29, 4   ;;  %s2344_s25 = smov %s1780_s26 }
 0x54a   : > { %s2345_s26 = smov %s1905_s14  ;;  %s2346_s27 = smov %s1788_s28 }
 0x54b   : > { %s2347_s28 = smov %s2349_s9  ;;  %19 = sbr.rel (!%p17_p10) target bundleno = 4 (0x4), region = 94 }
 0x550   :  { %1491 = vsyncpa [#allocation5], 1 }
 0x551   :  { %1493 = vsyncpa [#allocation5 + $0x1], 1 }

</bundles_post_ra>
